<compile_context>
chip_gen: v7x
topology: tpu7x:2x2x1
jax: 0.10.0
libtpu: 0.0.40
codegen_flags: <defaults>
</compile_context>

<pallas_src>
import jax
import jax.numpy as jnp
from jax.experimental import pallas as pl
from jax.experimental.pallas import tpu as pltpu


def _se_gate_conv1x1_kernel(x_ref, gate_ref, w_ref, o_ref):
    # x_ref:    (Cin, HW)   input feature map, NCHW flattened over spatial
    # gate_ref: (1, Cin)    pre-sigmoid per-channel SE gate
    # w_ref:    (Cout, Cin) 1x1 conv weight
    # o_ref:    (Cout, HW)
    g = jax.nn.sigmoid(gate_ref[...])                       # (1, Cin) f32, EUP
    w_gated = (w_ref[...] * g).astype(jnp.bfloat16)         # fold gate into W
    x_bf16 = x_ref[...].astype(jnp.bfloat16)                # MXU operand cast
    o_ref[...] = jnp.dot(
        w_gated, x_bf16, preferred_element_type=jnp.float32
    ).astype(o_ref.dtype)                                   # (Cout, HW)


def se_gate_conv1x1(x_nchw, gate_nc11, weight_oihw):
    """x_nchw: (1, Cin, H, W); gate_nc11: (1, Cin, 1, 1);
    weight_oihw: (Cout, Cin, 1, 1). Returns (1, Cout, H, W)."""
    N, Cin, H, W = x_nchw.shape
    Cout = weight_oihw.shape[0]
    assert N == 1, "module spec has batch 1"
    HW = H * W

    # Contiguous reshapes only (no transposes / layout plumbing).
    x2d = x_nchw.reshape(Cin, HW)            # (Cin, HW)
    gate2d = gate_nc11.reshape(1, Cin)       # (1, Cin)
    w2d = weight_oihw.reshape(Cout, Cin)     # (Cout, Cin)

    out2d = pl.pallas_call(
        _se_gate_conv1x1_kernel,
        out_shape=jax.ShapeDtypeStruct((Cout, HW), x_nchw.dtype),
        in_specs=[
            pl.BlockSpec(memory_space=pltpu.MemorySpace.VMEM),
            pl.BlockSpec(memory_space=pltpu.MemorySpace.VMEM),
            pl.BlockSpec(memory_space=pltpu.MemorySpace.VMEM),
        ],
        out_specs=pl.BlockSpec(memory_space=pltpu.MemorySpace.VMEM),
    )(x2d, gate2d, w2d)

    return out2d.reshape(N, Cout, H, W)      # contiguous, free


if __name__ == "__main__":
    key = jax.random.PRNGKey(0)
    k1, k2, k3 = jax.random.split(key, 3)

    N, Cin, H, W, Cout = 1, 1056, 14, 14, 176

    x313 = jax.random.normal(k1, (N, Cin, H, W), dtype=jnp.float32)
    x317 = jax.random.normal(k2, (N, Cin, 1, 1), dtype=jnp.float32)
    # Conv2d(1056 -> 176, 1x1, bias=False) weight, kaiming-ish scale.
    weight = jax.random.normal(k3, (Cout, Cin, 1, 1), dtype=jnp.float32) * (
        1.0 / (Cin ** 0.5)
    )

    out = se_gate_conv1x1(x313, x317, weight)
    out = jax.block_until_ready(out)

    # Reference (same math path as the PyTorch forward), f32 throughout.
    gated = x313 * jax.nn.sigmoid(x317)
    ref = jax.lax.conv_general_dilated(
        gated, weight, window_strides=(1, 1), padding="VALID",
        dimension_numbers=("NCHW", "OIHW", "NCHW"),
    )
    assert out.shape == (N, Cout, H, W)
    # bf16 matmul operands with f32 accumulation -> loosened tolerance.
    assert jnp.allclose(out, ref, atol=2e-2, rtol=2e-2)

    print("KERNEL_OK")
</pallas_src>

<mosaic_0001>
module attributes {stable_mosaic.version = 11 : i64} {
  func.func @_se_gate_conv1x1_kernel(%arg0: memref<1056x196xf32, #tpu.memory_space<vmem>>, %arg1: memref<1x1056xf32, #tpu.memory_space<vmem>>, %arg2: memref<176x1056xf32, #tpu.memory_space<vmem>>, %arg3: memref<176x196xf32, #tpu.memory_space<vmem>>) attributes {dimension_semantics = [], scalar_prefetch = 0 : i64, scratch_operands = 0 : i64, tpu.core_type = #tpu.core_type<tc>} {
    %c0 = arith.constant 0 : index
    %c0_0 = arith.constant 0 : index
    %0 = vector.load %arg1[%c0, %c0_0] : memref<1x1056xf32, #tpu.memory_space<vmem>>, vector<1x1056xf32>
    %1 = arith.negf %0 : vector<1x1056xf32>
    %2 = math.exp %1 : vector<1x1056xf32>
    %cst = arith.constant 1.000000e+00 : f32
    %3 = vector.broadcast %cst : f32 to vector<1x1056xf32>
    %4 = arith.addf %3, %2 : vector<1x1056xf32>
    %5 = arith.divf %3, %4 : vector<1x1056xf32>
    %c0_1 = arith.constant 0 : index
    %c0_2 = arith.constant 0 : index
    %6 = vector.load %arg2[%c0_1, %c0_2] : memref<176x1056xf32, #tpu.memory_space<vmem>>, vector<176x1056xf32>
    %7 = vector.broadcast %5 : vector<1x1056xf32> to vector<176x1056xf32>
    %8 = arith.mulf %6, %7 : vector<176x1056xf32>
    %9 = arith.truncf %8 : vector<176x1056xf32> to vector<176x1056xbf16>
    %c0_3 = arith.constant 0 : index
    %c0_4 = arith.constant 0 : index
    %10 = vector.load %arg0[%c0_3, %c0_4] : memref<1056x196xf32, #tpu.memory_space<vmem>>, vector<1056x196xf32>
    %11 = arith.truncf %10 : vector<1056x196xf32> to vector<1056x196xbf16>
    %cst_5 = arith.constant dense<0.000000e+00> : vector<176x196xf32>
    %12 = tpu.matmul %9, %11, %cst_5 {dimension_numbers = #tpu.dot_dimension_numbers<[1], [0], [0], [1], [0, 0, 1, 1], [], []>} : vector<176x1056xbf16>, vector<1056x196xbf16>, vector<176x196xf32> -> vector<176x196xf32>
    %c0_6 = arith.constant 0 : index
    %c0_7 = arith.constant 0 : index
    %13 = vector.load %arg3[%c0_6, %c0_7] : memref<176x196xf32, #tpu.memory_space<vmem>>, vector<176x196xf32>
    tpu.vector_store %arg3[%c0_6, %c0_7], %12 {strides = array<i32>} : memref<176x196xf32, #tpu.memory_space<vmem>>, vector<176x196xf32>,
    return
  }
}

</mosaic_0001>

<bundles_post_ra>
// kernel: tpu_custom_call.1
= control target key start
LH: loop header
LB: loop body
LE: loop exit
PB: predicated region body
PF: predicated region fallthrough
CT: control target
= control target key end

     0   :  { %s4055_s0 = inlined_call_operand.vmem [shape: f32[1056,196], index: 0, kind: input, shape index: {}]   ;;  %s4056_s1 = inlined_call_operand.vmem [shape: f32[1,1056], index: 1, kind: input, shape index: {}]   ;;  %s4057_s2 = inlined_call_operand.vmem [shape: f32[176,1056], index: 2, kind: input, shape index: {}]   ;;  %s4058_s3 = inlined_call_operand.hbm [shape: f32[176,196], index: 3, kind: output, shape index: {}]  }
   0x1   :  { %v573_v0 = vld [vmem:[%s4055_s0 + $0x8] sm:$0xff]  ;;  %v575_v1 = vld [vmem:[%s4055_s0 + $0x18] sm:$0xff]  ;;  %v572_v5 = vld [vmem:[%s4055_s0] sm:$0xff] }
   0x2   :  { %v701_v2 = vld [vmem:[%s4055_s0 + $0x408] sm:$0xff]  ;;  %v837_v3 = vpack.c.bf16 %v575_v1, %v573_v0  ;;  %v703_v4 = vld [vmem:[%s4055_s0 + $0x418] sm:$0xff]  ;;  %v574_v6 = vld [vmem:[%s4055_s0 + $0x10] sm:$0xff] }
   0x3   :  { %v901_v7 = vpack.c.bf16 %v703_v4, %v701_v2  ;;  %v836_v8 = vpack.c.bf16 %v574_v6, %v572_v5  ;;  %v700_v9 = vld [vmem:[%s4055_s0 + $0x400] sm:$0xff]  ;;  %v702_v10 = vld [vmem:[%s4055_s0 + $0x410] sm:$0xff]  ;;  %v577_v11 = vld [vmem:[%s4055_s0 + $0x28] sm:$0xff] }
   0x4   :  { %1002 = vmatprep.subr.bf16.mxu1 %v837_v3  ;;  %v900_v12 = vpack.c.bf16 %v702_v10, %v700_v9  ;;  %v579_v13 = vld [vmem:[%s4055_s0 + $0x38] sm:$0xff]  ;;  %v705_v14 = vld [vmem:[%s4055_s0 + $0x428] sm:$0xff]  ;;  %v576_v18 = vld [vmem:[%s4055_s0 + $0x20] sm:$0xff] }
   0x5   :  { %v707_v15 = vld [vmem:[%s4055_s0 + $0x438] sm:$0xff]  ;;  %1288 = vmatprep.subr.bf16.mxu0 %v901_v7  ;;  %1003 = vmatpush1.bf16.msra.mxu1 %v836_v8  ;;  %v839_v16 = vpack.c.bf16 %v579_v13, %v577_v11  ;;  %v578_v19 = vld [vmem:[%s4055_s0 + $0x30] sm:$0xff]  ;;  %v704_v20 = vld [vmem:[%s4055_s0 + $0x420] sm:$0xff] }
   0x6   :  { %v903_v17 = vpack.c.bf16 %v707_v15, %v705_v14  ;;  %1289 = vmatpush1.bf16.msra.mxu0 %v900_v12  ;;  %v838_v21 = vpack.c.bf16 %v578_v19, %v576_v18  ;;  %v706_v22 = vld [vmem:[%s4055_s0 + $0x430] sm:$0xff]  ;;  %v581_v23 = vld [vmem:[%s4055_s0 + $0x48] sm:$0xff]  ;;  %v583_v24 = vld [vmem:[%s4055_s0 + $0x58] sm:$0xff] }
   0x7   :  { %1004 = vmatprep.subr.bf16.mxu1 %v839_v16  ;;  %v902_v25 = vpack.c.bf16 %v706_v22, %v704_v20  ;;  %v841_v26 = vpack.c.bf16 %v583_v24, %v581_v23  ;;  %v709_v27 = vld [vmem:[%s4055_s0 + $0x448] sm:$0xff]  ;;  %v711_v28 = vld [vmem:[%s4055_s0 + $0x458] sm:$0xff]  ;;  %v580_v29 = vld [vmem:[%s4055_s0 + $0x40] sm:$0xff] }
   0x8   :  { %1290 = vmatprep.subr.bf16.mxu0 %v903_v17  ;;  %v905_v30 = vpack.c.bf16 %v711_v28, %v709_v27  ;;  %v582_v31 = vld [vmem:[%s4055_s0 + $0x50] sm:$0xff]  ;;  %v708_v32 = vld [vmem:[%s4055_s0 + $0x440] sm:$0xff]  ;;  %v585_v35 = vld [vmem:[%s4055_s0 + $0x68] sm:$0xff] }
   0x9   :  { %v710_v33 = vld [vmem:[%s4055_s0 + $0x450] sm:$0xff]  ;;  %1005 = vmatpush1.bf16.msra.mxu1 %v838_v21  ;;  %v840_v34 = vpack.c.bf16 %v582_v31, %v580_v29  ;;  %v587_v36 = vld [vmem:[%s4055_s0 + $0x78] sm:$0xff]  ;;  %v713_v37 = vld [vmem:[%s4055_s0 + $0x468] sm:$0xff] }
   0xa   :  { %1291 = vmatpush1.bf16.msra.mxu0 %v902_v25  ;;  %1006 = vmatprep.subr.bf16.mxu1 %v841_v26  ;;  %v904_v38 = vpack.c.bf16 %v710_v33, %v708_v32  ;;  %v843_v39 = vpack.c.bf16 %v587_v36, %v585_v35  ;;  %v715_v40 = vld [vmem:[%s4055_s0 + $0x478] sm:$0xff]  ;;  %v584_v41 = vld [vmem:[%s4055_s0 + $0x60] sm:$0xff]  ;;  %v586_v42 = vld [vmem:[%s4055_s0 + $0x70] sm:$0xff] }
   0xb   :  { %1292 = vmatprep.subr.bf16.mxu0 %v905_v30  ;;  %v907_v43 = vpack.c.bf16 %v715_v40, %v713_v37  ;;  %v712_v44 = vld [vmem:[%s4055_s0 + $0x460] sm:$0xff]  ;;  %v714_v45 = vld [vmem:[%s4055_s0 + $0x470] sm:$0xff]  ;;  %v589_v46 = vld [vmem:[%s4055_s0 + $0x88] sm:$0xff]  ;;  %v842_v50 = vpack.c.bf16 %v586_v42, %v584_v41 }
   0xc   :  { %v591_v47 = vld [vmem:[%s4055_s0 + $0x98] sm:$0xff]  ;;  %v717_v48 = vld [vmem:[%s4055_s0 + $0x488] sm:$0xff]  ;;  %v906_v51 = vpack.c.bf16 %v714_v45, %v712_v44  ;;  %v588_v53 = vld [vmem:[%s4055_s0 + $0x80] sm:$0xff] }
   0xd   :  { %v719_v49 = vld [vmem:[%s4055_s0 + $0x498] sm:$0xff]  ;;  %1007 = vmatpush1.bf16.msra.mxu1 %v840_v34  ;;  %v845_v52 = vpack.c.bf16 %v591_v47, %v589_v46  ;;  %v590_v54 = vld [vmem:[%s4055_s0 + $0x90] sm:$0xff]  ;;  %v716_v55 = vld [vmem:[%s4055_s0 + $0x480] sm:$0xff] }
   0xe   :  { %1293 = vmatpush1.bf16.msra.mxu0 %v904_v38  ;;  %1008 = vmatprep.subr.bf16.mxu1 %v843_v39  ;;  %v909_v56 = vpack.c.bf16 %v719_v49, %v717_v48  ;;  %v718_v57 = vld [vmem:[%s4055_s0 + $0x490] sm:$0xff]  ;;  %v593_v58 = vld [vmem:[%s4055_s0 + $0xa8] sm:$0xff]  ;;  %v595_v59 = vld [vmem:[%s4055_s0 + $0xb8] sm:$0xff]  ;;  %v844_v62 = vpack.c.bf16 %v590_v54, %v588_v53 }
   0xf   :  { %1294 = vmatprep.subr.bf16.mxu0 %v907_v43  ;;  %v721_v60 = vld [vmem:[%s4055_s0 + $0x4a8] sm:$0xff]  ;;  %v723_v61 = vld [vmem:[%s4055_s0 + $0x4b8] sm:$0xff]  ;;  %v908_v63 = vpack.c.bf16 %v718_v57, %v716_v55  ;;  %v847_v0 = vpack.c.bf16 %v595_v59, %v593_v58  ;;  %v592_v1 = vld [vmem:[%s4055_s0 + $0xa0] sm:$0xff] }
  0x10   :  { %v594_v2 = vld [vmem:[%s4055_s0 + $0xb0] sm:$0xff]  ;;  %v720_v3 = vld [vmem:[%s4055_s0 + $0x4a0] sm:$0xff]  ;;  %v911_v4 = vpack.c.bf16 %v723_v61, %v721_v60  ;;  %v597_v6 = vld [vmem:[%s4055_s0 + $0xc8] sm:$0xff] }
  0x11   :  { %1009 = vmatpush1.bf16.msra.mxu1 %v842_v50  ;;  %v722_v5 = vld [vmem:[%s4055_s0 + $0x4b0] sm:$0xff]  ;;  %v599_v7 = vld [vmem:[%s4055_s0 + $0xd8] sm:$0xff]  ;;  %v725_v8 = vld [vmem:[%s4055_s0 + $0x4c8] sm:$0xff]  ;;  %v846_v10 = vpack.c.bf16 %v594_v2, %v592_v1 }
  0x12   :  { %1295 = vmatpush1.bf16.msra.mxu0 %v906_v51  ;;  %1010 = vmatprep.subr.bf16.mxu1 %v845_v52  ;;  %v727_v9 = vld [vmem:[%s4055_s0 + $0x4d8] sm:$0xff]  ;;  %v910_v11 = vpack.c.bf16 %v722_v5, %v720_v3  ;;  %v849_v12 = vpack.c.bf16 %v599_v7, %v597_v6  ;;  %v596_v13 = vld [vmem:[%s4055_s0 + $0xc0] sm:$0xff]  ;;  %v598_v14 = vld [vmem:[%s4055_s0 + $0xd0] sm:$0xff] }
  0x13   :  { %1296 = vmatprep.subr.bf16.mxu0 %v909_v56  ;;  %v724_v15 = vld [vmem:[%s4055_s0 + $0x4c0] sm:$0xff]  ;;  %v913_v16 = vpack.c.bf16 %v727_v9, %v725_v8  ;;  %v726_v17 = vld [vmem:[%s4055_s0 + $0x4d0] sm:$0xff]  ;;  %v601_v18 = vld [vmem:[%s4055_s0 + $0xe8] sm:$0xff]  ;;  %v848_v22 = vpack.c.bf16 %v598_v14, %v596_v13 }
  0x14   :  { %v603_v19 = vld [vmem:[%s4055_s0 + $0xf8] sm:$0xff]  ;;  %v729_v20 = vld [vmem:[%s4055_s0 + $0x4e8] sm:$0xff]  ;;  %v912_v23 = vpack.c.bf16 %v726_v17, %v724_v15  ;;  %v600_v25 = vld [vmem:[%s4055_s0 + $0xe0] sm:$0xff] }
  0x15   :  { %1011 = vmatpush1.bf16.msra.mxu1 %v844_v62  ;;  %v731_v21 = vld [vmem:[%s4055_s0 + $0x4f8] sm:$0xff]  ;;  %v851_v24 = vpack.c.bf16 %v603_v19, %v601_v18  ;;  %v602_v26 = vld [vmem:[%s4055_s0 + $0xf0] sm:$0xff]  ;;  %v728_v27 = vld [vmem:[%s4055_s0 + $0x4e0] sm:$0xff] }
  0x16   :  { %1297 = vmatpush1.bf16.msra.mxu0 %v908_v63  ;;  %1012 = vmatprep.subr.bf16.mxu1 %v847_v0  ;;  %v915_v28 = vpack.c.bf16 %v731_v21, %v729_v20  ;;  %v730_v29 = vld [vmem:[%s4055_s0 + $0x4f0] sm:$0xff]  ;;  %v605_v30 = vld [vmem:[%s4055_s0 + $0x108] sm:$0xff]  ;;  %v607_v31 = vld [vmem:[%s4055_s0 + $0x118] sm:$0xff]  ;;  %v850_v34 = vpack.c.bf16 %v602_v26, %v600_v25 }
  0x17   :  { %1298 = vmatprep.subr.bf16.mxu0 %v911_v4  ;;  %v733_v32 = vld [vmem:[%s4055_s0 + $0x508] sm:$0xff]  ;;  %v735_v33 = vld [vmem:[%s4055_s0 + $0x518] sm:$0xff]  ;;  %v914_v35 = vpack.c.bf16 %v730_v29, %v728_v27  ;;  %v853_v36 = vpack.c.bf16 %v607_v31, %v605_v30  ;;  %v604_v37 = vld [vmem:[%s4055_s0 + $0x100] sm:$0xff] }
  0x18   :  { %v606_v38 = vld [vmem:[%s4055_s0 + $0x110] sm:$0xff]  ;;  %v732_v39 = vld [vmem:[%s4055_s0 + $0x500] sm:$0xff]  ;;  %v917_v40 = vpack.c.bf16 %v735_v33, %v733_v32  ;;  %v609_v42 = vld [vmem:[%s4055_s0 + $0x128] sm:$0xff] }
  0x19   :  { %1013 = vmatpush1.bf16.msra.mxu1 %v846_v10  ;;  %v734_v41 = vld [vmem:[%s4055_s0 + $0x510] sm:$0xff]  ;;  %v611_v43 = vld [vmem:[%s4055_s0 + $0x138] sm:$0xff]  ;;  %v737_v44 = vld [vmem:[%s4055_s0 + $0x528] sm:$0xff]  ;;  %v852_v46 = vpack.c.bf16 %v606_v38, %v604_v37 }
  0x1a   :  { %1299 = vmatpush1.bf16.msra.mxu0 %v910_v11  ;;  %1014 = vmatprep.subr.bf16.mxu1 %v849_v12  ;;  %v739_v45 = vld [vmem:[%s4055_s0 + $0x538] sm:$0xff]  ;;  %v916_v47 = vpack.c.bf16 %v734_v41, %v732_v39  ;;  %v855_v48 = vpack.c.bf16 %v611_v43, %v609_v42  ;;  %v608_v49 = vld [vmem:[%s4055_s0 + $0x120] sm:$0xff]  ;;  %v610_v50 = vld [vmem:[%s4055_s0 + $0x130] sm:$0xff] }
  0x1b   :  { %1300 = vmatprep.subr.bf16.mxu0 %v913_v16  ;;  %v736_v51 = vld [vmem:[%s4055_s0 + $0x520] sm:$0xff]  ;;  %v919_v52 = vpack.c.bf16 %v739_v45, %v737_v44  ;;  %v738_v53 = vld [vmem:[%s4055_s0 + $0x530] sm:$0xff]  ;;  %v613_v54 = vld [vmem:[%s4055_s0 + $0x148] sm:$0xff]  ;;  %v854_v58 = vpack.c.bf16 %v610_v50, %v608_v49 }
  0x1c   :  { %v615_v55 = vld [vmem:[%s4055_s0 + $0x158] sm:$0xff]  ;;  %v741_v56 = vld [vmem:[%s4055_s0 + $0x548] sm:$0xff]  ;;  %v918_v59 = vpack.c.bf16 %v738_v53, %v736_v51  ;;  %v612_v61 = vld [vmem:[%s4055_s0 + $0x140] sm:$0xff] }
  0x1d   :  { %1015 = vmatpush1.bf16.msra.mxu1 %v848_v22  ;;  %v743_v57 = vld [vmem:[%s4055_s0 + $0x558] sm:$0xff]  ;;  %v857_v60 = vpack.c.bf16 %v615_v55, %v613_v54  ;;  %v614_v62 = vld [vmem:[%s4055_s0 + $0x150] sm:$0xff]  ;;  %v740_v63 = vld [vmem:[%s4055_s0 + $0x540] sm:$0xff] }
  0x1e   :  { %1301 = vmatpush1.bf16.msra.mxu0 %v912_v23  ;;  %1016 = vmatprep.subr.bf16.mxu1 %v851_v24  ;;  %v921_v0 = vpack.c.bf16 %v743_v57, %v741_v56  ;;  %v742_v1 = vld [vmem:[%s4055_s0 + $0x550] sm:$0xff]  ;;  %v617_v2 = vld [vmem:[%s4055_s0 + $0x168] sm:$0xff]  ;;  %v619_v3 = vld [vmem:[%s4055_s0 + $0x178] sm:$0xff]  ;;  %v856_v6 = vpack.c.bf16 %v614_v62, %v612_v61 }
  0x1f   :  { %1302 = vmatprep.subr.bf16.mxu0 %v915_v28  ;;  %v745_v4 = vld [vmem:[%s4055_s0 + $0x568] sm:$0xff]  ;;  %v747_v5 = vld [vmem:[%s4055_s0 + $0x578] sm:$0xff]  ;;  %v616_v7 = vld [vmem:[%s4055_s0 + $0x160] sm:$0xff]  ;;  %v920_v8 = vpack.c.bf16 %v742_v1, %v740_v63  ;;  %v859_v9 = vpack.c.bf16 %v619_v3, %v617_v2 }
  0x20   :  { %v618_v10 = vld [vmem:[%s4055_s0 + $0x170] sm:$0xff]  ;;  %v744_v11 = vld [vmem:[%s4055_s0 + $0x560] sm:$0xff]  ;;  %v923_v13 = vpack.c.bf16 %v747_v5, %v745_v4  ;;  %v621_v14 = vld [vmem:[%s4055_s0 + $0x188] sm:$0xff] }
  0x21   :  { %1017 = vmatpush1.bf16.msra.mxu1 %v850_v34  ;;  %v746_v12 = vld [vmem:[%s4055_s0 + $0x570] sm:$0xff]  ;;  %v623_v15 = vld [vmem:[%s4055_s0 + $0x198] sm:$0xff]  ;;  %v16_v16 = vld [vmem:[%s4056_s1] sm:$0xff]  ;;  %v858_v20 = vpack.c.bf16 %v618_v10, %v616_v7 }
  0x22   :  { %1303 = vmatpush1.bf16.msra.mxu0 %v914_v35  ;;  %1018 = vmatprep.subr.bf16.mxu1 %v853_v36  ;;  %v749_v17 = vld [vmem:[%s4055_s0 + $0x588] sm:$0xff]  ;;  %v751_v18 = vld [vmem:[%s4055_s0 + $0x598] sm:$0xff]  ;;  %v1778_v19 = vmul.f32 -1.442695, %v16_v16  ;;  %v922_v21 = vpack.c.bf16 %v746_v12, %v744_v11  ;;  %v861_v22 = vpack.c.bf16 %v623_v15, %v621_v14  ;;  %v620_v23 = vld [vmem:[%s4055_s0 + $0x180] sm:$0xff] }
  0x23   :  { %1304 = vmatprep.subr.bf16.mxu0 %v917_v40  ;;  %v622_v24 = vld [vmem:[%s4055_s0 + $0x190] sm:$0xff]  ;;  %v748_v25 = vld [vmem:[%s4055_s0 + $0x580] sm:$0xff]  ;;  %v925_v26 = vpack.c.bf16 %v751_v18, %v749_v17  ;;  %v625_v28 = vld [vmem:[%s4055_s0 + $0x1a8] sm:$0xff] }
  0x24   :  { %2003 = vpow2.f32 %v1778_v19  ;;  %v750_v27 = vld [vmem:[%s4055_s0 + $0x590] sm:$0xff]  ;;  %v627_v29 = vld [vmem:[%s4055_s0 + $0x1b8] sm:$0xff]  ;;  %v753_v30 = vld [vmem:[%s4055_s0 + $0x5a8] sm:$0xff]  ;;  %v860_v32 = vpack.c.bf16 %v622_v24, %v620_v23 }
  0x25   :  { %1019 = vmatpush1.bf16.msra.mxu1 %v852_v46  ;;  %v755_v31 = vld [vmem:[%s4055_s0 + $0x5b8] sm:$0xff]  ;;  %v924_v33 = vpack.c.bf16 %v750_v27, %v748_v25  ;;  %v863_v34 = vpack.c.bf16 %v627_v29, %v625_v28  ;;  %v624_v35 = vld [vmem:[%s4055_s0 + $0x1a0] sm:$0xff]  ;;  %v626_v36 = vld [vmem:[%s4055_s0 + $0x1b0] sm:$0xff] }
  0x26   :  { %1305 = vmatpush1.bf16.msra.mxu0 %v916_v47  ;;  %1020 = vmatprep.subr.bf16.mxu1 %v855_v48  ;;  %v752_v37 = vld [vmem:[%s4055_s0 + $0x5a0] sm:$0xff]  ;;  %v927_v38 = vpack.c.bf16 %v755_v31, %v753_v30  ;;  %v754_v39 = vld [vmem:[%s4055_s0 + $0x5b0] sm:$0xff]  ;;  %v629_v40 = vld [vmem:[%s4055_s0 + $0x1c8] sm:$0xff]  ;;  %v862_v44 = vpack.c.bf16 %v626_v36, %v624_v35 }
  0x27   :  { %1306 = vmatprep.subr.bf16.mxu0 %v919_v52  ;;  %v631_v41 = vld [vmem:[%s4055_s0 + $0x1d8] sm:$0xff]  ;;  %v757_v42 = vld [vmem:[%s4055_s0 + $0x5c8] sm:$0xff]  ;;  %v926_v45 = vpack.c.bf16 %v754_v39, %v752_v37  ;;  %v628_v47 = vld [vmem:[%s4055_s0 + $0x1c0] sm:$0xff] }
  0x28   :  { %v759_v43 = vld [vmem:[%s4055_s0 + $0x5d8] sm:$0xff]  ;;  %v865_v46 = vpack.c.bf16 %v631_v41, %v629_v40  ;;  %v630_v48 = vld [vmem:[%s4055_s0 + $0x1d0] sm:$0xff]  ;;  %v756_v49 = vld [vmem:[%s4055_s0 + $0x5c0] sm:$0xff] }
  0x29   :  { %1021 = vmatpush1.bf16.msra.mxu1 %v854_v58  ;;  %v929_v50 = vpack.c.bf16 %v759_v43, %v757_v42  ;;  %v758_v51 = vld [vmem:[%s4055_s0 + $0x5d0] sm:$0xff]  ;;  %v633_v52 = vld [vmem:[%s4055_s0 + $0x1e8] sm:$0xff]  ;;  %v635_v53 = vld [vmem:[%s4055_s0 + $0x1f8] sm:$0xff]  ;;  %v864_v57 = vpack.c.bf16 %v630_v48, %v628_v47 }
  0x2a   :  { %1307 = vmatpush1.bf16.msra.mxu0 %v918_v59  ;;  %1022 = vmatprep.subr.bf16.mxu1 %v857_v60  ;;  %v761_v55 = vld [vmem:[%s4055_s0 + $0x5e8] sm:$0xff]  ;;  %v763_v56 = vld [vmem:[%s4055_s0 + $0x5f8] sm:$0xff]  ;;  %v230_v59 = vlaneseq  ;;  %v928_v60 = vpack.c.bf16 %v758_v51, %v756_v49  ;;  %v867_v61 = vpack.c.bf16 %v635_v53, %v633_v52  ;;  %v632_v62 = vld [vmem:[%s4055_s0 + $0x1e0] sm:$0xff] }
  0x2b   :  { %1308 = vmatprep.subr.bf16.mxu0 %v921_v0  ;;  %v634_v63 = vld [vmem:[%s4055_s0 + $0x1f0] sm:$0xff]  ;;  %v760_v0 = vld [vmem:[%s4055_s0 + $0x5e0] sm:$0xff]  ;;  %v931_v1 = vpack.c.bf16 %v763_v56, %v761_v55  ;;  %v637_v3 = vld [vmem:[%s4055_s0 + $0x208] sm:$0xff] }
  0x2c   :  { %v762_v2 = vld [vmem:[%s4055_s0 + $0x5f0] sm:$0xff]  ;;  %v639_v4 = vld [vmem:[%s4055_s0 + $0x218] sm:$0xff]  ;;  %v765_v5 = vld [vmem:[%s4055_s0 + $0x608] sm:$0xff]  ;;  %v866_v7 = vpack.c.bf16 %v634_v63, %v632_v62 }
  0x2d   :  { %1023 = vmatpush1.bf16.msra.mxu1 %v856_v6  ;;  %v767_v6 = vld [vmem:[%s4055_s0 + $0x618] sm:$0xff]  ;;  %v869_v10 = vpack.c.bf16 %v639_v4, %v637_v3  ;;  %v766_v14 = vld [vmem:[%s4055_s0 + $0x610] sm:$0xff]  ;;  %v769_v15 = vld [vmem:[%s4055_s0 + $0x628] sm:$0xff] }
  0x2e   :  { %1309 = vmatpush1.bf16.msra.mxu0 %v920_v8  ;;  %1024 = vmatprep.subr.bf16.mxu1 %v859_v9  ;;  %v2004_v54 = vpop.eup %2003  ;;  %v2458_v8 = vshrl.u32 %v230_v59, 7  ;;  %v930_v9 = vpack.c.bf16 %v762_v2, %v760_v0  ;;  %v2460_v11 = vpack.c.bf16 %v767_v6, %v765_v5  ;;  %v771_v19 = vld [vmem:[%s4055_s0 + $0x638] sm:$0xff]  ;;  %v40_v23 = vld [vmem:[%s4057_s2 + $0x50] sm:$0xff]  ;;  %v35_v27 = vld [vmem:[%s4057_s2 + $0x28] sm:$0xff] }
  0x2f   :  { %1310 = vmatprep.subr.bf16.mxu0 %v923_v13  ;;  %v24_v58 = vadd.f32 1.0, %v2004_v54  ;;  %v764_v13 = vld [vmem:[%s4055_s0 + $0x600] sm:$0xff]  ;;  %v770_v29 = vld [vmem:[%s4055_s0 + $0x630] sm:$0xff]  ;;  %v2520_v35 = vpack.c.bf16 %v771_v19, %v769_v15  ;;  %v2544_v42 = vld [vmem:[%s4055_s0 + $0x228] sm:$0xff] }
  0x30   :  { %v236_v12 = vsub.s32 1, %v2458_v8  ;;  %v252_v16 = vsub.s32 5, %v2458_v8  ;;  %v4059_v17 = vsub.s32 0, %v2458_v8  ;;  %v248_v18 = vsub.s32 4, %v2458_v8  ;;  %v768_v28 = vld [vmem:[%s4055_s0 + $0x620] sm:$0xff]  ;;  %v44_v31 = vld [vmem:[%s4057_s2 + $0x70] sm:$0xff] }
  0x31   :  { %1025 = vmatpush1.bf16.msra.mxu1 %v858_v20  ;;  %2005 = vrcp.f32 %v24_v58  ;;  %v2481_v20 = vld [vmem:[%s4055_s0 + $0x200] sm:$0xff]  ;;  %v244_v24 = vsub.s32 3, %v2458_v8  ;;  %v260_v25 = vsub.s32 7, %v2458_v8  ;;  %v2549_v43 = vld [vmem:[%s4055_s0 + $0x238] sm:$0xff]  ;;  %v642_v63 = vld [vmem:[%s4055_s0 + $0x230] sm:$0xff] }
  0x32   :  { %1311 = vmatpush1.bf16.msra.mxu0 %v922_v21  ;;  %1026 = vmatprep.subr.bf16.mxu1 %v861_v22  ;;  %v2486_v21 = vld [vmem:[%s4055_s0 + $0x210] sm:$0xff]  ;;  %v31_v22 = vld [vmem:[%s4057_s2 + $0x8] sm:$0xff]  ;;  %v34_v40 = vld [vmem:[%s4057_s2 + $0x20] sm:$0xff] }
  0x33   :  { %1312 = vmatprep.subr.bf16.mxu0 %v925_v26  ;;  %v240_v26 = vsub.s32 2, %v2458_v8  ;;  %v868_v36 = vpack.c.bf16 %v2486_v21, %v2481_v20  ;;  %v58_v54 = vld [vmem:[%s4057_s2 + $0xe0] sm:$0xff]  ;;  %v53_v55 = vld [vmem:[%s4057_s2 + $0xb8] sm:$0xff]  ;;  %v52_v5 = vld [vmem:[%s4057_s2 + $0xb0] sm:$0xff] }
  0x34   :  { %v62_v56 = vld [vmem:[%s4057_s2 + $0x100] sm:$0xff]  ;;  %v57_v4 = vld [vmem:[%s4057_s2 + $0xd8] sm:$0xff]  ;;  %v71_v15 = vld [vmem:[%s4057_s2 + $0x148] sm:$0xff] }
  0x35   :  { %1027 = vmatpush1.bf16.msra.mxu1 %v860_v32  ;;  %v30_v32 = vld [vmem:[%s4057_s2] sm:$0xff]  ;;  %v61_v6 = vld [vmem:[%s4057_s2 + $0xf8] sm:$0xff]  ;;  %v80_v20 = vld [vmem:[%s4057_s2 + $0x190] sm:$0xff] }
  0x36   :  { %1313 = vmatpush1.bf16.msra.mxu0 %v924_v33  ;;  %1028 = vmatprep.subr.bf16.mxu1 %v863_v34  ;;  %v39_v33 = vld [vmem:[%s4057_s2 + $0x48] sm:$0xff]  ;;  %v2518_v34 = vpack.c.bf16 %v766_v14, %v764_v13  ;;  %v640_v62 = vld [vmem:[%s4055_s0 + $0x220] sm:$0xff]  ;;  %v76_v14 = vld [vmem:[%s4057_s2 + $0x170] sm:$0xff] }
  0x37   :  { %1314 = vmatprep.subr.bf16.mxu0 %v927_v38  ;;  %v67_v13 = vld [vmem:[%s4057_s2 + $0x128] sm:$0xff]  ;;  %v870_v19 = vpack.c.bf16 %v642_v63, %v640_v62  ;;  %v651_v62 = vld [vmem:[%s4055_s0 + $0x278] sm:$0xff] }
  0x38   :  { %v645_v21 = vld [vmem:[%s4055_s0 + $0x248] sm:$0xff] }
  0x39   :  { %1029 = vmatpush1.bf16.msra.mxu1 %v862_v44  ;;  %v43_v44 = vld [vmem:[%s4057_s2 + $0x68] sm:$0xff] }
  0x3a   :  { %1315 = vmatpush1.bf16.msra.mxu0 %v926_v45  ;;  %1030 = vmatprep.subr.bf16.mxu1 %v865_v46  ;;  %v49_v45 = vld [vmem:[%s4057_s2 + $0x98] sm:$0xff]  ;;  %v2557_v46 = vpack.c.bf16 %v770_v29, %v768_v28 }
  0x3b   :  { %1316 = vmatprep.subr.bf16.mxu0 %v929_v50  ;;  %v2507_v30 = vpop.eup %2005  ;;  %v775_v28 = vld [vmem:[%s4055_s0 + $0x658] sm:$0xff] }
  0x3c   :  { %v2525_v37 = vrot.slane %v2507_v30, %v236_v12  ;;  %v2528_v38 = vrot.slane %v2507_v30, %v252_v16  ;;  %v2533_v39 = vrot.slane %v2507_v30, %v4059_v17  ;;  %v2539_v41 = vrot.slane %v2507_v30, %v248_v18  ;;  %v202_v17 = vld [vmem:[%s4057_s2 + $0x560] sm:$0xff] }
  0x3d   :  { %1031 = vmatpush1.bf16.msra.mxu1 %v864_v57  ;;  %v2560_v47 = vrot.slane %v2507_v30, %v244_v24  ;;  %v2563_v48 = vrot.slane %v2507_v30, %v260_v25  ;;  %v2566_v49 = vrot.slane %v2507_v30, %v240_v26 }
  0x3e   :  { %1317 = vmatpush1.bf16.msra.mxu0 %v928_v60  ;;  %1032 = vmatprep.subr.bf16.mxu1 %v867_v61  ;;  %v276_v50 = vmul.f32 %v2525_v37, %v31_v22  ;;  %v285_v51 = vmul.f32 %v2525_v37, %v40_v23  ;;  %v280_v52 = vmul.f32 %v2528_v38, %v35_v27  ;;  %v48_v60 = vld [vmem:[%s4057_s2 + $0x90] sm:$0xff]  ;;  %v647_v22 = vld [vmem:[%s4055_s0 + $0x258] sm:$0xff]  ;;  %v773_v27 = vld [vmem:[%s4055_s0 + $0x648] sm:$0xff] }
  0x3f   :  { %1318 = vmatprep.subr.bf16.mxu0 %v931_v1  ;;  %v289_v53 = vmul.f32 %v2528_v38, %v44_v31  ;;  %v275_v57 = vmul.f32 %v2533_v39, %v30_v32  ;;  %v284_v58 = vmul.f32 %v2533_v39, %v39_v33  ;;  %v279_v59 = vmul.f32 %v2539_v41, %v34_v40  ;;  %v772_v33 = vld [vmem:[%s4055_s0 + $0x640] sm:$0xff]  ;;  %v774_v40 = vld [vmem:[%s4055_s0 + $0x650] sm:$0xff] }
  0x40   :  { %v871_v61 = vpack.c.bf16 %v2549_v43, %v2544_v42  ;;  %v474_v0 = vpack.c.bf16 %v285_v51, %v276_v50  ;;  %v288_v2 = vmul.f32 %v2539_v41, %v43_v44  ;;  %v294_v3 = vmul.f32 %v2525_v37, %v49_v45  ;;  %v66_v45 = vld [vmem:[%s4057_s2 + $0x120] sm:$0xff]  ;;  %v75_v50 = vld [vmem:[%s4057_s2 + $0x168] sm:$0xff] }
  0x41   :  { %1033 = vmatpush1.bf16.msra.mxu1 %v866_v7  ;;  %v478_v1 = vpack.c.bf16 %v289_v53, %v280_v52  ;;  %v473_v7 = vpack.c.bf16 %v284_v58, %v275_v57  ;;  %v307_v12 = vmul.f32 %v2528_v38, %v62_v56  ;;  %v293_v18 = vmul.f32 %v2533_v39, %v48_v60  ;;  %v70_v51 = vld [vmem:[%s4057_s2 + $0x140] sm:$0xff]  ;;  %v777_v52 = vld [vmem:[%s4055_s0 + $0x668] sm:$0xff]  ;;  %v646_v57 = vld [vmem:[%s4055_s0 + $0x250] sm:$0xff] }
  0x42   :  { %1319 = vmatpush1.bf16.msra.mxu0 %v930_v9  ;;  %1145 = vmatprep.subr.bf16.mxu1 %v869_v10  ;;  %v303_v9 = vmul.f32 %v2525_v37, %v58_v54  ;;  %v298_v10 = vmul.f32 %v2528_v38, %v53_v55  ;;  %v477_v16 = vpack.c.bf16 %v288_v2, %v279_v59  ;;  %v79_v54 = vld [vmem:[%s4057_s2 + $0x188] sm:$0xff]  ;;  %v779_v55 = vld [vmem:[%s4055_s0 + $0x678] sm:$0xff]  ;;  %v644_v56 = vld [vmem:[%s4055_s0 + $0x240] sm:$0xff] }
  0x43   :  { %1431 = vmatprep.subr.bf16.mxu0 %v2460_v11  ;;  %1034 = vmatprep.mubr.bf16.mxu1 %v474_v0  ;;  %v302_v25 = vmul.f32 %v2533_v39, %v57_v4  ;;  %v297_v26 = vmul.f32 %v2539_v41, %v52_v5  ;;  %v306_v29 = vmul.f32 %v2539_v41, %v61_v6  ;;  %v776_v60 = vld [vmem:[%s4055_s0 + $0x660] sm:$0xff]  ;;  %v85_v2 = vld [vmem:[%s4057_s2 + $0x1b8] sm:$0xff]  ;;  %v781_v6 = vld [vmem:[%s4055_s0 + $0x688] sm:$0xff] }
  0x44   :  { %1320 = vmatprep.mubr.bf16.mxu0 %v478_v1  ;;  %1035 = vmatmul.mubr.bf16.vlgmr.msra.gmra.mrb[0].mxu1 %v473_v7  ;;  %v483_v23 = vpack.c.bf16 %v303_v9, %v294_v3  ;;  %v487_v24 = vpack.c.bf16 %v307_v12, %v298_v10  ;;  %v312_v31 = vmul.f32 %v2525_v37, %v67_v13  ;;  %v778_v1 = vld [vmem:[%s4055_s0 + $0x670] sm:$0xff]  ;;  %v94_v3 = vld [vmem:[%s4057_s2 + $0x200] sm:$0xff]  ;;  %v89_v7 = vld [vmem:[%s4057_s2 + $0x1d8] sm:$0xff] }
  0x45   :  { %1321 = vmatmul.mubr.bf16.vlgmr.msra.gmra.mrb[0].mxu0 %v477_v16  ;;  %1146 = vmatpush1.bf16.msra.mxu1 %v868_v36  ;;  %v321_v32 = vmul.f32 %v2525_v37, %v76_v14  ;;  %v316_v42 = vmul.f32 %v2528_v38, %v71_v15  ;;  %v325_v36 = vmul.f32 %v2528_v38, %v80_v20  ;;  %v98_v9 = vld [vmem:[%s4057_s2 + $0x220] sm:$0xff]  ;;  %v783_v14 = vld [vmem:[%s4055_s0 + $0x698] sm:$0xff] }
  0x46   :  { %1432 = vmatpush1.bf16.msra.mxu0 %v2518_v34  ;;  %1044 = vmatprep.mubr.bf16.mxu1 %v483_v23  ;;  %v873_v43 = vpack.c.bf16 %v647_v22, %v645_v21  ;;  %v2649_v44 = vpack.c.bf16 %v775_v28, %v773_v27  ;;  %v482_v53 = vpack.c.bf16 %v302_v25, %v293_v18  ;;  %v648_v16 = vld [vmem:[%s4055_s0 + $0x260] sm:$0xff]  ;;  %v650_v18 = vld [vmem:[%s4055_s0 + $0x270] sm:$0xff]  ;;  %v653_v22 = vld [vmem:[%s4055_s0 + $0x288] sm:$0xff] }
  0x47   :  { %1433 = vmatprep.subr.bf16.mxu0 %v2520_v35  ;;  %1330 = vmatprep.mubr.bf16.mxu0 %v487_v24  ;;  %v486_v58 = vpack.c.bf16 %v306_v29, %v297_v26  ;;  %v492_v59 = vpack.c.bf16 %v321_v32, %v312_v31  ;;  %v2685_v63 = vpack.c.bf16 %v774_v40, %v772_v33  ;;  %v655_v23 = vld [vmem:[%s4055_s0 + $0x298] sm:$0xff]  ;;  %v780_v27 = vld [vmem:[%s4055_s0 + $0x680] sm:$0xff]  ;;  %v782_v28 = vld [vmem:[%s4055_s0 + $0x690] sm:$0xff] }
  0x48   :  { %1147 = vmatprep.subr.bf16.mxu1 %v871_v61  ;;  %v649_v61 = vld [vmem:[%s4055_s0 + $0x268] sm:$0xff]  ;;  %v496_v0 = vpack.c.bf16 %v325_v36, %v316_v42  ;;  %v2697_v4 = vpack.c.bf16 %v779_v55, %v777_v52  ;;  %v872_v5 = vpack.c.bf16 %v646_v57, %v644_v56  ;;  %v311_v10 = vmul.f32 %v2533_v39, %v66_v45  ;;  %v84_v29 = vld [vmem:[%s4057_s2 + $0x1b0] sm:$0xff]  ;;  %v93_v32 = vld [vmem:[%s4057_s2 + $0x1f8] sm:$0xff] }
  0x49   :  { %1148 = vmatpush1.bf16.msra.mxu1 %v870_v19  ;;  %v320_v12 = vmul.f32 %v2533_v39, %v75_v50  ;;  %v315_v13 = vmul.f32 %v2539_v41, %v70_v51  ;;  %v875_v15 = vpack.c.bf16 %v651_v62, %v649_v61  ;;  %v324_v19 = vmul.f32 %v2539_v41, %v79_v54  ;;  %v88_v40 = vld [vmem:[%s4057_s2 + $0x1d0] sm:$0xff]  ;;  %v785_v42 = vld [vmem:[%s4055_s0 + $0x6a8] sm:$0xff]  ;;  %v787_v50 = vld [vmem:[%s4055_s0 + $0x6b8] sm:$0xff] }
  0x4a   :  { %1434 = vmatpush1.bf16.msra.mxu0 %v2557_v46  ;;  %1149 = vmatprep.subr.bf16.mxu1 %v873_v43  ;;  %v330_v20 = vmul.f32 %v2525_v37, %v85_v2  ;;  %v339_v21 = vmul.f32 %v2525_v37, %v94_v3  ;;  %v2730_v24 = vpack.c.bf16 %v778_v1, %v776_v60  ;;  %v97_v43 = vld [vmem:[%s4057_s2 + $0x218] sm:$0xff]  ;;  %v652_v51 = vld [vmem:[%s4055_s0 + $0x280] sm:$0xff]  ;;  %v654_v52 = vld [vmem:[%s4055_s0 + $0x290] sm:$0xff] }
  0x4b   :  { %1435 = vmatprep.subr.bf16.mxu0 %v2649_v44  ;;  %v334_v25 = vmul.f32 %v2528_v38, %v89_v7  ;;  %v343_v26 = vmul.f32 %v2528_v38, %v98_v9  ;;  %v2744_v31 = vpack.c.bf16 %v783_v14, %v781_v6  ;;  %v874_v33 = vpack.c.bf16 %v650_v18, %v648_v16  ;;  %v784_v55 = vld [vmem:[%s4055_s0 + $0x6a0] sm:$0xff]  ;;  %v657_v56 = vld [vmem:[%s4055_s0 + $0x2a8] sm:$0xff]  ;;  %v659_v57 = vld [vmem:[%s4055_s0 + $0x2b8] sm:$0xff] }
  0x4c   :  { %1045 = vmatmul.mubr.bf16.gmra.mrb[4].mxu1 %v482_v53  ;;  %v491_v36 = vpack.c.bf16 %v320_v12, %v311_v10  ;;  %v877_v45 = vpack.c.bf16 %v655_v23, %v653_v22  ;;  %v495_v53 = vpack.c.bf16 %v324_v19, %v315_v13  ;;  %v501_v54 = vpack.c.bf16 %v339_v21, %v330_v20  ;;  %v786_v60 = vld [vmem:[%s4055_s0 + $0x6b0] sm:$0xff]  ;;  %v103_v61 = vld [vmem:[%s4057_s2 + $0x248] sm:$0xff]  ;;  %v791_v10 = vld [vmem:[%s4055_s0 + $0x6d8] sm:$0xff] }
  0x4d   :  { %1331 = vmatmul.mubr.bf16.gmra.mrb[4].mxu0 %v486_v58  ;;  %1054 = vmatprep.mubr.bf16.mxu1 %v492_v59  ;;  %v505_v58 = vpack.c.bf16 %v343_v26, %v334_v25  ;;  %v2777_v59 = vpack.c.bf16 %v782_v28, %v780_v27  ;;  %v112_v62 = vld [vmem:[%s4057_s2 + $0x290] sm:$0xff]  ;;  %v2792_v1 = vpack.c.bf16 %v787_v50, %v785_v42  ;;  %v107_v3 = vld [vmem:[%s4057_s2 + $0x268] sm:$0xff]  ;;  %v656_v13 = vld [vmem:[%s4055_s0 + $0x2a0] sm:$0xff] }
  0x4e   :  { %1436 = vmatpush1.bf16.msra.mxu0 %v2685_v63  ;;  %1340 = vmatprep.mubr.bf16.mxu0 %v496_v0  ;;  %v2790_v0 = vmul.f32 %v2533_v39, %v84_v29  ;;  %v876_v2 = vpack.c.bf16 %v654_v52, %v652_v51  ;;  %v789_v6 = vld [vmem:[%s4055_s0 + $0x6c8] sm:$0xff]  ;;  %v338_v7 = vmul.f32 %v2533_v39, %v93_v32  ;;  %v658_v14 = vld [vmem:[%s4055_s0 + $0x2b0] sm:$0xff]  ;;  %v663_v20 = vld [vmem:[%s4055_s0 + $0x2d8] sm:$0xff] }
  0x4f   :  { %1437 = vmatprep.subr.bf16.mxu0 %v2697_v4  ;;  %1150 = vmatpush1.bf16.msra.mxu1 %v872_v5  ;;  %v116_v5 = vld [vmem:[%s4057_s2 + $0x2b0] sm:$0xff]  ;;  %v333_v9 = vmul.f32 %v2539_v41, %v88_v40  ;;  %v879_v12 = vpack.c.bf16 %v659_v57, %v657_v56  ;;  %v348_v16 = vmul.f32 %v2525_v37, %v103_v61  ;;  %v661_v19 = vld [vmem:[%s4055_s0 + $0x2c8] sm:$0xff]  ;;  %v102_v25 = vld [vmem:[%s4057_s2 + $0x240] sm:$0xff] }
  0x50   :  { %1151 = vmatprep.subr.bf16.mxu1 %v875_v15  ;;  %v342_v15 = vmul.f32 %v2539_v41, %v97_v43  ;;  %v357_v18 = vmul.f32 %v2525_v37, %v112_v62  ;;  %v2824_v21 = vpack.c.bf16 %v786_v60, %v784_v55  ;;  %v352_v22 = vmul.f32 %v2528_v38, %v107_v3  ;;  %v111_v26 = vld [vmem:[%s4057_s2 + $0x288] sm:$0xff]  ;;  %v106_v27 = vld [vmem:[%s4057_s2 + $0x260] sm:$0xff]  ;;  %v790_v32 = vld [vmem:[%s4055_s0 + $0x6d0] sm:$0xff] }
  0x51   :  { %v361_v23 = vmul.f32 %v2528_v38, %v116_v5  ;;  %v2838_v28 = vpack.c.bf16 %v791_v10, %v789_v6  ;;  %v788_v29 = vld [vmem:[%s4055_s0 + $0x6c0] sm:$0xff]  ;;  %v793_v40 = vld [vmem:[%s4055_s0 + $0x6e8] sm:$0xff]  ;;  %v500_v42 = vpack.c.bf16 %v338_v7, %v2790_v0  ;;  %v881_v43 = vpack.c.bf16 %v663_v20, %v661_v19  ;;  %v662_v51 = vld [vmem:[%s4055_s0 + $0x2d0] sm:$0xff] }
  0x52   :  { %1438 = vmatpush1.bf16.msra.mxu0 %v2730_v24  ;;  %v660_v50 = vld [vmem:[%s4055_s0 + $0x2c0] sm:$0xff]  ;;  %v504_v52 = vpack.c.bf16 %v342_v15, %v333_v9  ;;  %v665_v55 = vld [vmem:[%s4055_s0 + $0x2e8] sm:$0xff]  ;;  %v667_v56 = vld [vmem:[%s4055_s0 + $0x2f8] sm:$0xff]  ;;  %v2884_v0 = vmul.f32 %v2533_v39, %v102_v25  ;;  %v356_v9 = vmul.f32 %v2533_v39, %v111_v26  ;;  %v351_v10 = vmul.f32 %v2539_v41, %v106_v27 }
  0x53   :  { %1439 = vmatprep.subr.bf16.mxu0 %v2744_v31  ;;  %1152 = vmatpush1.bf16.msra.mxu1 %v874_v33  ;;  %v878_v33 = vpack.c.bf16 %v658_v14, %v656_v13  ;;  %v514_v57 = vpack.c.bf16 %v361_v23, %v352_v22  ;;  %v130_v60 = vld [vmem:[%s4057_s2 + $0x320] sm:$0xff]  ;;  %v125_v61 = vld [vmem:[%s4057_s2 + $0x2f8] sm:$0xff]  ;;  %v880_v3 = vpack.c.bf16 %v662_v51, %v660_v50  ;;  %v794_v6 = vld [vmem:[%s4055_s0 + $0x6f0] sm:$0xff] }
  0x54   :  { %1055 = vmatmul.mubr.bf16.gmra.mrb[8].mxu1 %v491_v36  ;;  %1153 = vmatprep.subr.bf16.mxu1 %v877_v45  ;;  %v115_v36 = vld [vmem:[%s4057_s2 + $0x2a8] sm:$0xff]  ;;  %v795_v45 = vld [vmem:[%s4055_s0 + $0x6f8] sm:$0xff]  ;;  %v134_v62 = vld [vmem:[%s4057_s2 + $0x340] sm:$0xff]  ;;  %v883_v13 = vpack.c.bf16 %v667_v56, %v665_v55  ;;  %v375_v19 = vmul.f32 %v2525_v37, %v130_v60  ;;  %v370_v23 = vmul.f32 %v2528_v38, %v125_v61 }
  0x55   :  { %1341 = vmatmul.mubr.bf16.gmra.mrb[8].mxu0 %v495_v53  ;;  %1064 = vmatprep.mubr.bf16.mxu1 %v501_v54  ;;  %v510_v53 = vpack.c.bf16 %v357_v18, %v348_v16  ;;  %v121_v54 = vld [vmem:[%s4057_s2 + $0x2d8] sm:$0xff]  ;;  %v792_v5 = vld [vmem:[%s4055_s0 + $0x6e0] sm:$0xff]  ;;  %v797_v7 = vld [vmem:[%s4055_s0 + $0x708] sm:$0xff]  ;;  %v360_v16 = vmul.f32 %v2539_v41, %v115_v36  ;;  %v379_v25 = vmul.f32 %v2528_v38, %v134_v62 }
  0x56   :  { %1350 = vmatprep.mubr.bf16.mxu0 %v505_v58  ;;  %1440 = vmatpush1.bf16.msra.mxu0 %v2777_v59  ;;  %v2872_v58 = vpack.c.bf16 %v790_v32, %v788_v29  ;;  %v664_v14 = vld [vmem:[%s4055_s0 + $0x2e0] sm:$0xff]  ;;  %v666_v15 = vld [vmem:[%s4055_s0 + $0x2f0] sm:$0xff]  ;;  %v366_v18 = vmul.f32 %v2525_v37, %v121_v54  ;;  %v669_v20 = vld [vmem:[%s4055_s0 + $0x308] sm:$0xff]  ;;  %v2924_v27 = vpack.c.bf16 %v794_v6, %v792_v5 }
  0x57   :  { %1441 = vmatprep.subr.bf16.mxu0 %v2792_v1  ;;  %1154 = vmatpush1.bf16.msra.mxu1 %v876_v2  ;;  %v2887_v2 = vpack.c.bf16 %v795_v45, %v793_v40  ;;  %v671_v22 = vld [vmem:[%s4055_s0 + $0x318] sm:$0xff]  ;;  %v120_v26 = vld [vmem:[%s4057_s2 + $0x2d0] sm:$0xff]  ;;  %v796_v40 = vld [vmem:[%s4055_s0 + $0x700] sm:$0xff]  ;;  %v882_v36 = vpack.c.bf16 %v666_v15, %v664_v14  ;;  %v509_v45 = vpack.c.bf16 %v356_v9, %v2884_v0 }
  0x58   :  { %1155 = vmatprep.subr.bf16.mxu1 %v879_v12  ;;  %v799_v12 = vld [vmem:[%s4055_s0 + $0x718] sm:$0xff]  ;;  %v124_v32 = vld [vmem:[%s4057_s2 + $0x2f0] sm:$0xff]  ;;  %v885_v51 = vpack.c.bf16 %v671_v22, %v669_v20  ;;  %v513_v55 = vpack.c.bf16 %v360_v16, %v351_v10  ;;  %v519_v56 = vpack.c.bf16 %v375_v19, %v366_v18  ;;  %v673_v60 = vld [vmem:[%s4055_s0 + $0x328] sm:$0xff]  ;;  %v523_v62 = vpack.c.bf16 %v379_v25, %v370_v23 }
  0x59   :  { %v129_v29 = vld [vmem:[%s4057_s2 + $0x318] sm:$0xff]  ;;  %v670_v54 = vld [vmem:[%s4055_s0 + $0x310] sm:$0xff]  ;;  %v143_v5 = vld [vmem:[%s4057_s2 + $0x388] sm:$0xff]  ;;  %v369_v16 = vmul.f32 %v2539_v41, %v124_v32 }
  0x5a   :  { %1442 = vmatpush1.bf16.msra.mxu0 %v2824_v21  ;;  %v133_v50 = vld [vmem:[%s4057_s2 + $0x338] sm:$0xff]  ;;  %v152_v6 = vld [vmem:[%s4057_s2 + $0x3d0] sm:$0xff]  ;;  %v805_v14 = vld [vmem:[%s4055_s0 + $0x748] sm:$0xff]  ;;  %v374_v15 = vmul.f32 %v2533_v39, %v129_v29 }
  0x5b   :  { %1443 = vmatprep.subr.bf16.mxu0 %v2838_v28  ;;  %1156 = vmatpush1.bf16.msra.mxu1 %v878_v33  ;;  %v2933_v33 = vpack.c.bf16 %v799_v12, %v797_v7  ;;  %v675_v61 = vld [vmem:[%s4055_s0 + $0x338] sm:$0xff]  ;;  %v2979_v7 = vmul.f32 %v2533_v39, %v120_v26  ;;  %v800_v12 = vld [vmem:[%s4055_s0 + $0x720] sm:$0xff]  ;;  %v674_v22 = vld [vmem:[%s4055_s0 + $0x330] sm:$0xff]  ;;  %v378_v23 = vmul.f32 %v2539_v41, %v133_v50 }
  0x5c   :  { %1065 = vmatmul.mubr.bf16.gmra.mrb[12].mxu1 %v500_v42  ;;  %1157 = vmatprep.subr.bf16.mxu1 %v881_v43  ;;  %v798_v42 = vld [vmem:[%s4055_s0 + $0x710] sm:$0xff]  ;;  %v801_v43 = vld [vmem:[%s4055_s0 + $0x728] sm:$0xff]  ;;  %v807_v18 = vld [vmem:[%s4055_s0 + $0x758] sm:$0xff]  ;;  %v887_v19 = vpack.c.bf16 %v675_v61, %v673_v60 }
  0x5d   :  { %1351 = vmatmul.mubr.bf16.gmra.mrb[12].mxu0 %v504_v52  ;;  %1074 = vmatprep.mubr.bf16.mxu1 %v510_v53  ;;  %v803_v52 = vld [vmem:[%s4055_s0 + $0x738] sm:$0xff]  ;;  %v668_v53 = vld [vmem:[%s4055_s0 + $0x300] sm:$0xff]  ;;  %v2967_v0 = vpack.c.bf16 %v798_v42, %v796_v40  ;;  %v677_v29 = vld [vmem:[%s4055_s0 + $0x348] sm:$0xff]  ;;  %v388_v40 = vmul.f32 %v2528_v38, %v143_v5  ;;  %v397_v42 = vmul.f32 %v2528_v38, %v152_v6 }
  0x5e   :  { %1360 = vmatprep.mubr.bf16.mxu0 %v514_v57  ;;  %1444 = vmatpush1.bf16.msra.mxu0 %v2872_v58  ;;  %v139_v57 = vld [vmem:[%s4057_s2 + $0x368] sm:$0xff]  ;;  %v2982_v9 = vpack.c.bf16 %v803_v52, %v801_v43  ;;  %v884_v10 = vpack.c.bf16 %v670_v54, %v668_v53  ;;  %v672_v20 = vld [vmem:[%s4055_s0 + $0x320] sm:$0xff]  ;;  %v679_v32 = vld [vmem:[%s4055_s0 + $0x358] sm:$0xff]  ;;  %v522_v5 = vpack.c.bf16 %v378_v23, %v369_v16 }
  0x5f   :  { %1445 = vmatprep.subr.bf16.mxu0 %v2887_v2  ;;  %1158 = vmatpush1.bf16.msra.mxu1 %v880_v3  ;;  %v148_v3 = vld [vmem:[%s4057_s2 + $0x3b0] sm:$0xff]  ;;  %v384_v25 = vmul.f32 %v2525_v37, %v139_v57  ;;  %v142_v50 = vld [vmem:[%s4057_s2 + $0x380] sm:$0xff]  ;;  %v886_v54 = vpack.c.bf16 %v674_v22, %v672_v20  ;;  %v151_v57 = vld [vmem:[%s4057_s2 + $0x3c8] sm:$0xff]  ;;  %v889_v60 = vpack.c.bf16 %v679_v32, %v677_v29 }
  0x60   :  { %1159 = vmatprep.subr.bf16.mxu1 %v883_v13  ;;  %v802_v13 = vld [vmem:[%s4055_s0 + $0x730] sm:$0xff]  ;;  %v393_v26 = vmul.f32 %v2525_v37, %v148_v3  ;;  %v804_v52 = vld [vmem:[%s4055_s0 + $0x740] sm:$0xff]  ;;  %v811_v61 = vld [vmem:[%s4055_s0 + $0x778] sm:$0xff]  ;;  %v3090_v32 = vmul.f32 %v2539_v41, %v142_v50 }
  0x61   :  { %v3019_v43 = vpack.c.bf16 %v802_v13, %v800_v12  ;;  %v806_v53 = vld [vmem:[%s4055_s0 + $0x750] sm:$0xff]  ;;  %v683_v12 = vld [vmem:[%s4055_s0 + $0x378] sm:$0xff]  ;;  %v532_v13 = vpack.c.bf16 %v397_v42, %v388_v40  ;;  %v170_v16 = vld [vmem:[%s4057_s2 + $0x460] sm:$0xff] }
  0x62   :  { %1446 = vmatpush1.bf16.msra.mxu0 %v2924_v27  ;;  %v678_v3 = vld [vmem:[%s4055_s0 + $0x350] sm:$0xff]  ;;  %v528_v6 = vpack.c.bf16 %v393_v26, %v384_v25  ;;  %v808_v23 = vld [vmem:[%s4055_s0 + $0x760] sm:$0xff]  ;;  %v813_v26 = vld [vmem:[%s4055_s0 + $0x788] sm:$0xff] }
  0x63   :  { %1447 = vmatprep.subr.bf16.mxu0 %v2933_v33  ;;  %1160 = vmatpush1.bf16.msra.mxu1 %v882_v36  ;;  %v138_v36 = vld [vmem:[%s4057_s2 + $0x360] sm:$0xff]  ;;  %v810_v25 = vld [vmem:[%s4055_s0 + $0x770] sm:$0xff]  ;;  %v815_v40 = vld [vmem:[%s4055_s0 + $0x798] sm:$0xff] }
  0x64   :  { %1075 = vmatmul.mubr.bf16.gmra.mrb[16].mxu1 %v509_v45  ;;  %1161 = vmatprep.subr.bf16.mxu1 %v885_v51  ;;  %v147_v45 = vld [vmem:[%s4057_s2 + $0x3a8] sm:$0xff]  ;;  %v3028_v51 = vpack.c.bf16 %v807_v18, %v805_v14  ;;  %v166_v14 = vld [vmem:[%s4057_s2 + $0x440] sm:$0xff]  ;;  %v3071_v18 = vpack.c.bf16 %v806_v53, %v804_v52  ;;  %v682_v52 = vld [vmem:[%s4055_s0 + $0x370] sm:$0xff] }
  0x65   :  { %1361 = vmatmul.mubr.bf16.gmra.mrb[16].mxu0 %v513_v55  ;;  %1084 = vmatprep.mubr.bf16.mxu1 %v519_v56  ;;  %v809_v55 = vld [vmem:[%s4055_s0 + $0x768] sm:$0xff]  ;;  %v518_v56 = vpack.c.bf16 %v374_v15, %v2979_v7  ;;  %v157_v7 = vld [vmem:[%s4057_s2 + $0x3f8] sm:$0xff]  ;;  %v392_v29 = vmul.f32 %v2533_v39, %v147_v45  ;;  %v396_v45 = vmul.f32 %v2539_v41, %v151_v57  ;;  %v156_v57 = vld [vmem:[%s4057_s2 + $0x3f0] sm:$0xff] }
  0x66   :  { %1370 = vmatprep.mubr.bf16.mxu0 %v523_v62  ;;  %1448 = vmatpush1.bf16.msra.mxu0 %v2967_v0  ;;  %v676_v62 = vld [vmem:[%s4055_s0 + $0x340] sm:$0xff]  ;;  %v161_v15 = vld [vmem:[%s4057_s2 + $0x418] sm:$0xff]  ;;  %v3077_v20 = vpack.c.bf16 %v811_v61, %v809_v55  ;;  %v402_v50 = vmul.f32 %v2525_v37, %v157_v7  ;;  %v411_v53 = vmul.f32 %v2525_v37, %v166_v14  ;;  %v814_v7 = vld [vmem:[%s4055_s0 + $0x790] sm:$0xff] }
  0x67   :  { %1449 = vmatprep.subr.bf16.mxu0 %v2982_v9  ;;  %1162 = vmatpush1.bf16.msra.mxu1 %v884_v10  ;;  %v681_v10 = vld [vmem:[%s4055_s0 + $0x368] sm:$0xff]  ;;  %v888_v22 = vpack.c.bf16 %v678_v3, %v676_v62  ;;  %v687_v55 = vld [vmem:[%s4055_s0 + $0x398] sm:$0xff]  ;;  %v3116_v61 = vpack.c.bf16 %v810_v25, %v808_v23  ;;  %v160_v3 = vld [vmem:[%s4057_s2 + $0x410] sm:$0xff] }
  0x68   :  { %1163 = vmatprep.subr.bf16.mxu1 %v887_v19  ;;  %v3074_v19 = vmul.f32 %v2533_v39, %v138_v36  ;;  %v891_v42 = vpack.c.bf16 %v683_v12, %v681_v10  ;;  %v680_v36 = vld [vmem:[%s4055_s0 + $0x360] sm:$0xff]  ;;  %v165_v62 = vld [vmem:[%s4057_s2 + $0x438] sm:$0xff]  ;;  %v817_v12 = vld [vmem:[%s4055_s0 + $0x7a8] sm:$0xff] }
  0x69   :  { %v890_v10 = vpack.c.bf16 %v682_v52, %v680_v36  ;;  %v684_v23 = vld [vmem:[%s4055_s0 + $0x380] sm:$0xff]  ;;  %v686_v25 = vld [vmem:[%s4055_s0 + $0x390] sm:$0xff]  ;;  %v3161_v52 = vmul.f32 %v2533_v39, %v156_v57 }
  0x6a   :  { %1450 = vmatpush1.bf16.msra.mxu0 %v3019_v43  ;;  %v527_v14 = vpack.c.bf16 %v392_v29, %v3074_v19  ;;  %v531_v19 = vpack.c.bf16 %v396_v45, %v3090_v32  ;;  %v175_v29 = vld [vmem:[%s4057_s2 + $0x488] sm:$0xff]  ;;  %v184_v32 = vld [vmem:[%s4057_s2 + $0x4d0] sm:$0xff]  ;;  %v688_v57 = vld [vmem:[%s4055_s0 + $0x3a0] sm:$0xff] }
  0x6b   :  { %1451 = vmatprep.subr.bf16.mxu0 %v3028_v51  ;;  %1164 = vmatpush1.bf16.msra.mxu1 %v886_v54  ;;  %v685_v54 = vld [vmem:[%s4055_s0 + $0x388] sm:$0xff] }
  0x6c   :  { %1085 = vmatmul.mubr.bf16.gmra.mrb[20].mxu1 %v518_v56  ;;  %1165 = vmatprep.subr.bf16.mxu1 %v889_v60  ;;  %v406_v56 = vmul.f32 %v2528_v38, %v161_v15  ;;  %v415_v60 = vmul.f32 %v2528_v38, %v170_v16  ;;  %v169_v15 = vld [vmem:[%s4057_s2 + $0x458] sm:$0xff]  ;;  %v893_v16 = vpack.c.bf16 %v687_v55, %v685_v54  ;;  %v179_v45 = vld [vmem:[%s4057_s2 + $0x4a8] sm:$0xff] }
  0x6d   :  { %1371 = vmatmul.mubr.bf16.gmra.mrb[20].mxu0 %v522_v5  ;;  %1094 = vmatprep.mubr.bf16.mxu1 %v528_v6  ;;  %v3125_v5 = vpack.c.bf16 %v815_v40, %v813_v26  ;;  %v812_v6 = vld [vmem:[%s4055_s0 + $0x780] sm:$0xff]  ;;  %v537_v26 = vpack.c.bf16 %v411_v53, %v402_v50  ;;  %v689_v40 = vld [vmem:[%s4055_s0 + $0x3a8] sm:$0xff]  ;;  %v188_v50 = vld [vmem:[%s4057_s2 + $0x4f0] sm:$0xff]  ;;  %v892_v55 = vpack.c.bf16 %v686_v25, %v684_v23 }
  0x6e   :  { %1380 = vmatprep.mubr.bf16.mxu0 %v532_v13  ;;  %1452 = vmatpush1.bf16.msra.mxu0 %v3071_v18  ;;  %v256_v13 = vsub.s32 6, %v2458_v8  ;;  %v541_v36 = vpack.c.bf16 %v415_v60, %v406_v56  ;;  %v3173_v53 = vpack.c.bf16 %v814_v7, %v812_v6  ;;  %v816_v56 = vld [vmem:[%s4055_s0 + $0x7a0] sm:$0xff]  ;;  %v818_v60 = vld [vmem:[%s4055_s0 + $0x7b0] sm:$0xff]  ;;  %v410_v7 = vmul.f32 %v2533_v39, %v165_v62  ;;  %v821_v23 = vld [vmem:[%s4055_s0 + $0x7c8] sm:$0xff] }
  0x6f   :  { %1453 = vmatprep.subr.bf16.mxu0 %v3077_v20  ;;  %1166 = vmatpush1.bf16.msra.mxu1 %v888_v22  ;;  %v819_v22 = vld [vmem:[%s4055_s0 + $0x7b8] sm:$0xff]  ;;  %v414_v62 = vmul.f32 %v2539_v41, %v169_v15  ;;  %v424_v25 = vmul.f32 %v2528_v38, %v179_v45  ;;  %v174_v15 = vld [vmem:[%s4057_s2 + $0x480] sm:$0xff]  ;;  %v822_v45 = vld [vmem:[%s4055_s0 + $0x7d0] sm:$0xff] }
  0x70   :  { %1167 = vmatprep.subr.bf16.mxu1 %v891_v42  ;;  %v691_v42 = vld [vmem:[%s4055_s0 + $0x3b8] sm:$0xff]  ;;  %4062 = vst [vmem:[#allocation5_spill] sm:$0xff] %v3173_v53  ;;  %v3176_v54 = vpack.c.bf16 %v819_v22, %v817_v12  ;;  %v3188_v6 = vrot.slane %v2507_v30, %v256_v13  ;;  %v690_v22 = vld [vmem:[%s4055_s0 + $0x3b0] sm:$0xff]  ;;  %v429_v13 = vmul.f32 %v2525_v37, %v184_v32  ;;  %v820_v32 = vld [vmem:[%s4055_s0 + $0x7c0] sm:$0xff] }
  0x71   :  { %v895_v12 = vpack.c.bf16 %v691_v42, %v689_v40  ;;  %v823_v30 = vld [vmem:[%s4055_s0 + $0x7d8] sm:$0xff]  ;;  %v178_v40 = vld [vmem:[%s4057_s2 + $0x4a0] sm:$0xff]  ;;  %v894_v42 = vpack.c.bf16 %v690_v22, %v688_v57  ;;  %v694_v57 = vld [vmem:[%s4055_s0 + $0x3d0] sm:$0xff] }
  0x72   :  { %1454 = vmatpush1.bf16.msra.mxu0 %v3116_v61  ;;  %4063 = vst [vmem:[#allocation6_spill] sm:$0xff] %v3176_v54  ;;  %v825_v22 = vld [vmem:[%s4055_s0 + $0x7e8] sm:$0xff] }
  0x73   :  { %1455 = vmatprep.subr.bf16.mxu0 %v3125_v5  ;;  %1168 = vmatpush1.bf16.msra.mxu1 %v890_v10  ;;  %v405_v10 = vmul.f32 %v2539_v41, %v160_v3  ;;  %v420_v3 = vmul.f32 %v2525_v37, %v175_v29  ;;  %v183_v29 = vld [vmem:[%s4057_s2 + $0x4c8] sm:$0xff] }
  0x74   :  { %1095 = vmatmul.mubr.bf16.gmra.mrb[24].mxu1 %v527_v14  ;;  %1169 = vmatprep.subr.bf16.mxu1 %v893_v16  ;;  %v693_v14 = vld [vmem:[%s4055_s0 + $0x3c8] sm:$0xff]  ;;  %v695_v16 = vld [vmem:[%s4055_s0 + $0x3d8] sm:$0xff] }
  0x75   :  { %1381 = vmatmul.mubr.bf16.gmra.mrb[24].mxu0 %v531_v19  ;;  %1104 = vmatprep.mubr.bf16.mxu1 %v537_v26  ;;  %v433_v19 = vmul.f32 %v2528_v38, %v188_v50  ;;  %v3216_v26 = vpack.c.bf16 %v818_v60, %v816_v56  ;;  %v692_v50 = vld [vmem:[%s4055_s0 + $0x3c0] sm:$0xff]  ;;  %v536_v56 = vpack.c.bf16 %v410_v7, %v3161_v52  ;;  %v193_v7 = vld [vmem:[%s4057_s2 + $0x518] sm:$0xff] }
  0x76   :  { %1390 = vmatprep.mubr.bf16.mxu0 %v541_v36  ;;  %1456 = vmatpush1.bf16.msra.mxu0 %v3173_v53  ;;  %v3225_v36 = vpack.c.bf16 %v823_v30, %v821_v23  ;;  %v897_v60 = vpack.c.bf16 %v695_v16, %v693_v14  ;;  %v827_v23 = vld [vmem:[%s4055_s0 + $0x7f8] sm:$0xff]  ;;  %v540_v30 = vpack.c.bf16 %v414_v62, %v405_v10  ;;  %v206_v62 = vld [vmem:[%s4057_s2 + $0x580] sm:$0xff]  ;;  %v826_v53 = vld [vmem:[%s4055_s0 + $0x7f0] sm:$0xff] }
  0x77   :  { %1457 = vmatprep.subr.bf16.mxu0 %v3176_v54  ;;  %1170 = vmatpush1.bf16.msra.mxu1 %v892_v55  ;;  %v187_v55 = vld [vmem:[%s4057_s2 + $0x4e8] sm:$0xff]  ;;  %v546_v52 = vpack.c.bf16 %v429_v13, %v420_v3  ;;  %v699_v14 = vld [vmem:[%s4055_s0 + $0x3f8] sm:$0xff]  ;;  %v550_v16 = vpack.c.bf16 %v433_v19, %v424_v25  ;;  %v3268_v3 = vpack.c.bf16 %v822_v45, %v820_v32  ;;  %v824_v54 = vld [vmem:[%s4055_s0 + $0x7e0] sm:$0xff] }
  0x78   :  { %1171 = vmatprep.subr.bf16.mxu1 %v895_v12  ;;  %v697_v12 = vld [vmem:[%s4055_s0 + $0x3e8] sm:$0xff]  ;;  %v197_v10 = vld [vmem:[%s4057_s2 + $0x538] sm:$0xff]  ;;  %v419_v13 = vmul.f32 %v2533_v39, %v174_v15  ;;  %v896_v25 = vpack.c.bf16 %v694_v57, %v692_v50  ;;  %v3272_v19 = vpack.c.bf16 %v827_v23, %v825_v22  ;;  %v696_v32 = vld [vmem:[%s4055_s0 + $0x3e0] sm:$0xff]  ;;  %v428_v15 = vmul.f32 %v2533_v39, %v183_v29 }
  0x79   :  { %v899_v45 = vpack.c.bf16 %v699_v14, %v697_v12  ;;  %v698_v50 = vld [vmem:[%s4055_s0 + $0x3f0] sm:$0xff]  ;;  %v829_v57 = vld [vmem:[%s4055_s0 + $0x808] sm:$0xff]  ;;  %v831_v22 = vld [vmem:[%s4055_s0 + $0x818] sm:$0xff]  ;;  %v432_v29 = vmul.f32 %v2539_v41, %v187_v55  ;;  %v451_v23 = vmul.f32 %v2528_v38, %v206_v62  ;;  %v3300_v12 = vpack.c.bf16 %v826_v53, %v824_v54 }
  0x7a   :  { %1458 = vmatpush1.bf16.msra.mxu0 %v3216_v26  ;;  %v545_v14 = vpack.c.bf16 %v428_v15, %v419_v13  ;;  %v196_v53 = vld [vmem:[%s4057_s2 + $0x530] sm:$0xff]  ;;  %v211_v62 = vld [vmem:[%s4057_s2 + $0x5a8] sm:$0xff] }
  0x7b   :  { %1172 = vmatpush1.bf16.msra.mxu1 %v894_v42  ;;  %1459 = vmatprep.subr.bf16.mxu0 %v3225_v36  ;;  %v423_v42 = vmul.f32 %v2539_v41, %v178_v40  ;;  %v438_v40 = vmul.f32 %v2525_v37, %v193_v7  ;;  %v220_v13 = vld [vmem:[%s4057_s2 + $0x5f0] sm:$0xff] }
  0x7c   :  { %1105 = vmatmul.mubr.bf16.gmra.mrb[28].mxu1 %v536_v56  ;;  %1173 = vmatprep.subr.bf16.mxu1 %v897_v60  ;;  %v447_v56 = vmul.f32 %v2525_v37, %v202_v17  ;;  %v442_v60 = vmul.f32 %v2528_v38, %v197_v10  ;;  %v192_v17 = vld [vmem:[%s4057_s2 + $0x510] sm:$0xff]  ;;  %v205_v10 = vld [vmem:[%s4057_s2 + $0x578] sm:$0xff] }
  0x7d   :  { %1391 = vmatmul.mubr.bf16.gmra.mrb[28].mxu0 %v540_v30  ;;  %1114 = vmatprep.mubr.bf16.mxu1 %v546_v52  ;;  %v898_v30 = vpack.c.bf16 %v698_v50, %v696_v32  ;;  %v965_v52 = vpack.c.bf16 %v831_v22, %v829_v57  ;;  %v549_v55 = vpack.c.bf16 %v432_v29, %v423_v42  ;;  %v224_v32 = vld [vmem:[%s4057_s2 + $0x610] sm:$0xff] }
  0x7e   :  { %1400 = vmatprep.mubr.bf16.mxu0 %v550_v16  ;;  %1460 = vmatpush1.bf16.msra.mxu0 %v3268_v3  ;;  %v555_v7 = vpack.c.bf16 %v447_v56, %v438_v40  ;;  %v201_v16 = vld [vmem:[%s4057_s2 + $0x558] sm:$0xff]  ;;  %v559_v54 = vpack.c.bf16 %v451_v23, %v442_v60  ;;  %v437_v15 = vmul.f32 %v2533_v39, %v192_v17  ;;  %v46_v17 = vld [vmem:[%s4057_s2 + $0x80] sm:$0xff] }
  0x7f   :  { %1174 = vmatpush1.bf16.msra.mxu1 %v896_v25  ;;  %1461 = vmatprep.subr.bf16.mxu0 %v3272_v19  ;;  %v215_v25 = vld [vmem:[%s4057_s2 + $0x5c8] sm:$0xff]  ;;  %v446_v42 = vmul.f32 %v2533_v39, %v201_v16  ;;  %v450_v50 = vmul.f32 %v2539_v41, %v205_v10  ;;  %v456_v57 = vmul.f32 %v2525_v37, %v211_v62 }
  0x80   :  { %1175 = vmatprep.subr.bf16.mxu1 %v899_v45  ;;  %v441_v45 = vmul.f32 %v2539_v41, %v196_v53  ;;  %v465_v22 = vmul.f32 %v2525_v37, %v220_v13  ;;  %v460_v29 = vmul.f32 %v2528_v38, %v215_v25  ;;  %v469_v40 = vmul.f32 %v2528_v38, %v224_v32  ;;  %v214_v37 = vld [vmem:[%s4057_s2 + $0x5c0] sm:$0xff]  ;;  %v223_v38 = vld [vmem:[%s4057_s2 + $0x608] sm:$0xff] }
  0x81   :  { %v554_v56 = vpack.c.bf16 %v446_v42, %v437_v15  ;;  %v468_v10 = vmul.f32 %v2539_v41, %v223_v38  ;;  %v291_v32 = vmul.f32 %v2563_v48, %v46_v17 }
  0x82   :  { %1462 = vmatpush1.bf16.msra.mxu0 %v3300_v12  ;;  %v558_v60 = vpack.c.bf16 %v450_v50, %v441_v45  ;;  %v564_v23 = vpack.c.bf16 %v465_v22, %v456_v57  ;;  %v36_v50 = vld [vmem:[%s4057_s2 + $0x30] sm:$0xff]  ;;  %v45_v57 = vld [vmem:[%s4057_s2 + $0x78] sm:$0xff] }
  0x83   :  { %1176 = vmatpush1.bf16.msra.mxu1 %v898_v30  ;;  %1574 = vmatprep.subr.bf16.mxu0 %v965_v52  ;;  %v219_v30 = vld [vmem:[%s4057_s2 + $0x5e8] sm:$0xff]  ;;  %v568_v52 = vpack.c.bf16 %v469_v40, %v460_v29  ;;  %v60_v40 = vld [vmem:[%s4057_s2 + $0xf0] sm:$0xff] }
  0x84   :  { %1115 = vmatmul.mubr.bf16.gmra.mrb[32].mxu1 %v545_v14  ;;  %1791 = vmatprep.subr.bf16.mxu1 %v2460_v11  ;;  %v210_v11 = vld [vmem:[%s4057_s2 + $0x5a0] sm:$0xff]  ;;  %v33_v14 = vld [vmem:[%s4057_s2 + $0x18] sm:$0xff]  ;;  %v464_v53 = vmul.f32 %v2533_v39, %v219_v30  ;;  %v51_v29 = vld [vmem:[%s4057_s2 + $0xa8] sm:$0xff] }
  0x85   :  { %1401 = vmatmul.mubr.bf16.gmra.mrb[32].mxu0 %v549_v55  ;;  %1124 = vmatprep.mubr.bf16.mxu1 %v555_v7  ;;  %v42_v55 = vld [vmem:[%s4057_s2 + $0x60] sm:$0xff]  ;;  %v37_v7 = vld [vmem:[%s4057_s2 + $0x38] sm:$0xff]  ;;  %v455_v16 = vmul.f32 %v2533_v39, %v210_v11  ;;  %v278_v62 = vmul.f32 %v2560_v47, %v33_v14  ;;  %v32_v39 = vld [vmem:[%s4057_s2 + $0x10] sm:$0xff] }
  0x86   :  { %1410 = vmatprep.mubr.bf16.mxu0 %v559_v54  ;;  %v459_v54 = vmul.f32 %v2539_v41, %v214_v37  ;;  %v287_v13 = vmul.f32 %v2560_v47, %v42_v55  ;;  %v282_v25 = vmul.f32 %v2563_v48, %v37_v7  ;;  %v41_v41 = vld [vmem:[%s4057_s2 + $0x58] sm:$0xff] }
  0x87   :  { %v563_v15 = vpack.c.bf16 %v464_v53, %v455_v16 }
  0x88   :  { %v567_v42 = vpack.c.bf16 %v468_v10, %v459_v54  ;;  %v476_v45 = vpack.c.bf16 %v287_v13, %v278_v62  ;;  %v480_v22 = vpack.c.bf16 %v291_v32, %v282_v25 }
  0x8c   :  { %1125 = vmatmul.mubr.bf16.gmra.mrb[36].mxu1 %v554_v56 }
  0x8d   :  { %1411 = vmatmul.mubr.bf16.gmra.mrb[36].mxu0 %v558_v60  ;;  %1134 = vmatprep.mubr.bf16.mxu1 %v564_v23 }
  0x8e   :  { %1420 = vmatprep.mubr.bf16.mxu0 %v568_v52 }
  0x8f   :  { %8 = vsyncpa [#allocation3], 0  ;;  %v277_v56 = vmul.f32 %v2566_v49, %v32_v39  ;;  %v286_v60 = vmul.f32 %v2566_v49, %v41_v41  ;;  %v281_v23 = vmul.f32 %v3188_v6, %v36_v50  ;;  %v55_v11 = vld [vmem:[%s4057_s2 + $0xc8] sm:$0xff]  ;;  %v64_v30 = vld [vmem:[%s4057_s2 + $0x110] sm:$0xff]  ;;  %v290_v37 = vmul.f32 %v3188_v6, %v45_v57 }
  0x90   :  { %v296_v52 = vmul.f32 %v2560_v47, %v51_v29  ;;  %v305_v38 = vmul.f32 %v2560_v47, %v60_v40  ;;  %v828_v14 = vld [vmem:[%s4055_s0 + $0x800] sm:$0xff]  ;;  %v830_v55 = vld [vmem:[%s4055_s0 + $0x810] sm:$0xff]  ;;  %v300_v7 = vmul.f32 %v2563_v48, %v55_v11  ;;  %v309_v17 = vmul.f32 %v2563_v48, %v64_v30  ;;  %v59_v54 = vld [vmem:[%s4057_s2 + $0xe8] sm:$0xff] }
  0x91   :  { %v475_v16 = vpack.c.bf16 %v286_v60, %v277_v56  ;;  %v50_v53 = vld [vmem:[%s4057_s2 + $0xa0] sm:$0xff]  ;;  %v17_v62 = vld [vmem:[%s4056_s1 + $0x8] sm:$0x1]  ;;  %v479_v13 = vpack.c.bf16 %v290_v37, %v281_v23  ;;  %v835_v39 = vld [vmem:[%s4055_s0 + $0x838] sm:$0xff]  ;;  %v304_v60 = vmul.f32 %v2566_v49, %v59_v54  ;;  %vm968_vm0 = vcmask 261120  }
  0x92   :  { %v54_v10 = vld [vmem:[%s4057_s2 + $0xc0] sm:$0xff]  ;;  %v485_v25 = vpack.c.bf16 %v305_v38, %v296_v52  ;;  %v63_v32 = vld [vmem:[%s4057_s2 + $0x108] sm:$0xff]  ;;  %v73_v50 = vld [vmem:[%s4057_s2 + $0x158] sm:$0xff]  ;;  %v489_v57 = vpack.c.bf16 %v309_v17, %v300_v7  ;;  %v295_v56 = vmul.f32 %v2566_v49, %v50_v53  ;;  %v1779_v38 = vmul.f32 -1.442695, %v17_v62 }
  0x93   :  { %v78_v41 = vld [vmem:[%s4057_s2 + $0x180] sm:$0xff]  ;;  %v834_v40 = vld [vmem:[%s4055_s0 + $0x830] sm:$0xff]  ;;  %v299_v23 = vmul.f32 %v3188_v6, %v54_v10  ;;  %v308_v30 = vmul.f32 %v3188_v6, %v63_v32  ;;  %v81_v62 = vld [vmem:[%s4057_s2 + $0x198] sm:$0xff]  ;;  %vm1718_vm1 = vcmask 556032  }
  0x94   :  { %1135 = vmatmul.mubr.bf16.gmra.mrb[40].mxu1 %v563_v15  ;;  %v833_v15 = vld [vmem:[%s4055_s0 + $0x828] sm:$0xff]  ;;  %v832_v29 = vld [vmem:[%s4055_s0 + $0x820] sm:$0xff]  ;;  %v323_v52 = vmul.f32 %v2560_v47, %v78_v41  ;;  %v484_v17 = vpack.c.bf16 %v304_v60, %v295_v56  ;;  %v68_v54 = vld [vmem:[%s4057_s2 + $0x130] sm:$0xff]  ;;  %2007 = vpow2.f32 %v1779_v38 }
  0x95   :  { %1421 = vmatmul.mubr.bf16.gmra.mrb[40].mxu0 %v567_v42  ;;  %1177 = vmatprep.mubr.bf16.mxu1 %v476_v45  ;;  %v964_v42 = vpack.c.bf16 %v830_v55, %v828_v14  ;;  %v69_v45 = vld [vmem:[%s4057_s2 + $0x138] sm:$0xff]  ;;  %v967_v11 = vpack.c.bf16 %v835_v39, %v833_v15  ;;  %v318_v14 = vmul.f32 %v2563_v48, %v73_v50  ;;  %v72_v10 = vld [vmem:[%s4057_s2 + $0x150] sm:$0xff]  ;;  %v86_v56 = vld [vmem:[%s4057_s2 + $0x1c0] sm:$0xff] }
  0x96   :  { %1463 = vmatprep.mubr.bf16.mxu0 %v480_v22  ;;  %v82_v22 = vld [vmem:[%s4057_s2 + $0x1a0] sm:$0xff]  ;;  %v314_v37 = vmul.f32 %v2560_v47, %v69_v45  ;;  %v966_v7 = vpack.c.bf16 %v834_v40, %v832_v29  ;;  %v100_v32 = vld [vmem:[%s4057_s2 + $0x230] sm:$0xff]  ;;  %v313_v15 = vmul.f32 %v2566_v49, %v68_v54  ;;  %v326_v45 = vmul.f32 %v3188_v6, %v81_v62  ;;  %v95_v60 = vld [vmem:[%s4057_s2 + $0x208] sm:$0xff] }
  0x97   :  { %v327_v55 = vmul.f32 %v2563_v48, %v82_v22  ;;  %v331_v38 = vmul.f32 %v2566_v49, %v86_v56  ;;  %v104_v62 = vld [vmem:[%s4057_s2 + $0x250] sm:$0xff]  ;;  %v122_v56 = vld [vmem:[%s4057_s2 + $0x2e0] sm:$0xff] }
  0x98   :  { %v494_v53 = vpack.c.bf16 %v323_v52, %v314_v37  ;;  %v109_v37 = vld [vmem:[%s4057_s2 + $0x278] sm:$0xff] }
  0x9c   :  { %1178 = vmatmul.mubr.bf16.vlgmr.msra.gmra.mrb[0].mxu1 %v475_v16  ;;  %v488_v16 = vpack.c.bf16 %v308_v30, %v299_v23  ;;  %v114_v30 = vld [vmem:[%s4057_s2 + $0x2a0] sm:$0xff] }
  0x9d   :  { %1464 = vmatmul.mubr.bf16.vlgmr.msra.gmra.mrb[0].mxu0 %v479_v13  ;;  %1187 = vmatprep.mubr.bf16.mxu1 %v485_v25  ;;  %v87_v13 = vld [vmem:[%s4057_s2 + $0x1c8] sm:$0xff]  ;;  %v96_v25 = vld [vmem:[%s4057_s2 + $0x210] sm:$0xff] }
  0x9e   :  { %1575 = vmatpush1.bf16.msra.mxu0 %v964_v42  ;;  %1807 = vmatpush1.bf16.msra.mxu1 %v2518_v34  ;;  %v77_v34 = vld [vmem:[%s4057_s2 + $0x178] sm:$0xff]  ;;  %v317_v42 = vmul.f32 %v3188_v6, %v72_v10  ;;  %v341_v41 = vmul.f32 %v2560_v47, %v96_v25  ;;  %v2008_v52 = vpop.eup %2007 }
  0x9f   :  { %1473 = vmatprep.mubr.bf16.mxu0 %v489_v57  ;;  %1792 = vmatprep.subr.bf16.mxu1 %v2520_v35  ;;  %v498_v35 = vpack.c.bf16 %v327_v55, %v318_v14  ;;  %v322_v39 = vmul.f32 %v2566_v49, %v77_v34  ;;  %v345_v57 = vmul.f32 %v2563_v48, %v100_v32  ;;  %v25_v54 = vadd.f32 1.0, %v2008_v52  ;;  %v132_v32 = vld [vmem:[%s4057_s2 + $0x330] sm:$0xff] }
  0xa0   :  { %1576 = vmatprep.subr.bf16.mxu0 %v967_v11  ;;  %v497_v29 = vpack.c.bf16 %v326_v45, %v317_v42  ;;  %v105_v11 = vld [vmem:[%s4057_s2 + $0x258] sm:$0xff]  ;;  %v340_v14 = vmul.f32 %v2566_v49, %v95_v60  ;;  %v131_v60 = vld [vmem:[%s4057_s2 + $0x328] sm:$0xff] }
  0xa1   :  { %v493_v22 = vpack.c.bf16 %v322_v39, %v313_v15  ;;  %2009 = vrcp.f32 %v25_v54  ;;  %v127_v15 = vld [vmem:[%s4057_s2 + $0x308] sm:$0xff]  ;;  %v136_v39 = vld [vmem:[%s4057_s2 + $0x350] sm:$0xff] }
  0xa2   :  { %1808 = vmatpush1.bf16.msra.mxu1 %v2557_v46  ;;  %1577 = vmatpush1.bf16.msra.mxu0 %v966_v7  ;;  %v91_v46 = vld [vmem:[%s4057_s2 + $0x1e8] sm:$0xff]  ;;  %v350_v7 = vmul.f32 %v2560_v47, %v105_v11  ;;  %v502_v34 = vpack.c.bf16 %v340_v14, %v331_v38  ;;  %v367_v11 = vmul.f32 %v2566_v49, %v122_v56 }
  0xa3   :  { %1793 = vmatprep.subr.bf16.mxu1 %v2649_v44  ;;  %v332_v44 = vmul.f32 %v2560_v47, %v87_v13  ;;  %v336_v50 = vmul.f32 %v2563_v48, %v91_v46  ;;  %v113_v13 = vld [vmem:[%s4057_s2 + $0x298] sm:$0xff]  ;;  %v123_v46 = vld [vmem:[%s4057_s2 + $0x2e8] sm:$0xff] }
  0xa4   :  { %1188 = vmatmul.mubr.bf16.gmra.mrb[4].mxu1 %v484_v17  ;;  %v359_v17 = vmul.f32 %v2560_v47, %v114_v30  ;;  %v358_v42 = vmul.f32 %v2566_v49, %v113_v13  ;;  %v376_v30 = vmul.f32 %v2566_v49, %v131_v60  ;;  %v83_v56 = vld [vmem:[%s4057_s2 + $0x1a8] sm:$0xff] }
  0xa5   :  { %1474 = vmatmul.mubr.bf16.gmra.mrb[4].mxu0 %v488_v16  ;;  %1197 = vmatprep.mubr.bf16.mxu1 %v494_v53  ;;  %v503_v40 = vpack.c.bf16 %v341_v41, %v332_v44  ;;  %v507_v23 = vpack.c.bf16 %v345_v57, %v336_v50  ;;  %v354_v16 = vmul.f32 %v2563_v48, %v109_v37  ;;  %v195_v60 = vld [vmem:[%s4057_s2 + $0x528] sm:$0xff] }
  0xa6   :  { %1483 = vmatprep.mubr.bf16.mxu0 %v498_v35  ;;  %1809 = vmatpush1.bf16.msra.mxu1 %v2685_v63  ;;  %v90_v63 = vld [vmem:[%s4057_s2 + $0x1e0] sm:$0xff]  ;;  %v512_v35 = vpack.c.bf16 %v359_v17, %v350_v7  ;;  %v377_v41 = vmul.f32 %v2560_v47, %v132_v32  ;;  %v372_v50 = vmul.f32 %v2563_v48, %v127_v15  ;;  %v140_v17 = vld [vmem:[%s4057_s2 + $0x370] sm:$0xff] }
  0xa7   :  { %1794 = vmatprep.subr.bf16.mxu1 %v2697_v4  ;;  %v99_v4 = vld [vmem:[%s4057_s2 + $0x228] sm:$0xff]  ;;  %v335_v55 = vmul.f32 %v3188_v6, %v90_v63  ;;  %v381_v57 = vmul.f32 %v2563_v48, %v136_v39  ;;  %v126_v63 = vld [vmem:[%s4057_s2 + $0x300] sm:$0xff]  ;;  %v385_v54 = vmul.f32 %v2566_v49, %v140_v17  ;;  %v56_v32 = vld [vmem:[%s4057_s2 + $0xd0] sm:$0xff] }
  0xa8   :  { %v371_v37 = vmul.f32 %v3188_v6, %v126_v63  ;;  %v186_v15 = vld [vmem:[%s4057_s2 + $0x4e0] sm:$0xff]  ;;  %v204_v63 = vld [vmem:[%s4057_s2 + $0x570] sm:$0xff] }
  0xaa   :  { %1810 = vmatpush1.bf16.msra.mxu1 %v2730_v24  ;;  %v118_v24 = vld [vmem:[%s4057_s2 + $0x2c0] sm:$0xff] }
  0xab   :  { %1795 = vmatprep.subr.bf16.mxu1 %v2744_v31  ;;  %v344_v31 = vmul.f32 %v3188_v6, %v99_v4  ;;  %v363_v53 = vmul.f32 %v2563_v48, %v118_v24  ;;  %v150_v4 = vld [vmem:[%s4057_s2 + $0x3c0] sm:$0xff]  ;;  %v2010_v24 = vpop.eup %2009 }
  0xac   :  { %1198 = vmatmul.mubr.bf16.gmra.mrb[8].mxu1 %v493_v22  ;;  %v395_v38 = vmul.f32 %v2560_v47, %v150_v4 }
  0xad   :  { %1484 = vmatmul.mubr.bf16.gmra.mrb[8].mxu0 %v497_v29  ;;  %1207 = vmatprep.mubr.bf16.mxu1 %v503_v40  ;;  %v506_v10 = vpack.c.bf16 %v344_v31, %v335_v55  ;;  %v516_v25 = vpack.c.bf16 %v363_v53, %v354_v16  ;;  %v520_v55 = vpack.c.bf16 %v376_v30, %v367_v11  ;;  %v149_v16 = vld [vmem:[%s4057_s2 + $0x3b8] sm:$0xff]  ;;  %v168_v53 = vld [vmem:[%s4057_s2 + $0x450] sm:$0xff] }
  0xae   :  { %1493 = vmatprep.mubr.bf16.mxu0 %v507_v23  ;;  %1811 = vmatpush1.bf16.msra.mxu1 %v2777_v59  ;;  %v108_v59 = vld [vmem:[%s4057_s2 + $0x270] sm:$0xff]  ;;  %v525_v23 = vpack.c.bf16 %v381_v57, %v372_v50  ;;  %v413_v13 = vmul.f32 %v2560_v47, %v168_v53  ;;  %v440_v11 = vmul.f32 %v2560_v47, %v195_v60  ;;  %v221_v53 = vld [vmem:[%s4057_s2 + $0x5f8] sm:$0xff] }
  0xaf   :  { %1796 = vmatprep.subr.bf16.mxu1 %v2792_v1  ;;  %v117_v1 = vld [vmem:[%s4057_s2 + $0x2b8] sm:$0xff]  ;;  %v353_v45 = vmul.f32 %v3188_v6, %v108_v59  ;;  %v2035_v59 = vmov 0   ;;  %v449_v30 = vmul.f32 %v2560_v47, %v204_v63  ;;  %v190_v63 = vld [vmem:[%s4057_s2 + $0x500] sm:$0xff] }
  0xb0   :  { %v362_v44 = vmul.f32 %v3188_v6, %v117_v1  ;;  %v158_v1 = vld [vmem:[%s4057_s2 + $0x400] sm:$0xff]  ;;  %v181_v60 = vld [vmem:[%s4057_s2 + $0x4b8] sm:$0xff] }
  0xb1   :  { %v403_v39 = vmul.f32 %v2566_v49, %v158_v1 }
  0xb2   :  { %1812 = vmatpush1.bf16.msra.mxu1 %v2824_v21  ;;  %v349_v21 = vmul.f32 %v2566_v49, %v104_v62  ;;  %v515_v29 = vpack.c.bf16 %v362_v44, %v353_v45 }
  0xb3   :  { %1797 = vmatprep.subr.bf16.mxu1 %v2838_v28  ;;  %v368_v28 = vmul.f32 %v2560_v47, %v123_v46  ;;  %v167_v46 = vld [vmem:[%s4057_s2 + $0x448] sm:$0xff] }
  0xb4   :  { %1208 = vmatmul.mubr.bf16.gmra.mrb[12].mxu1 %v502_v34  ;;  %v511_v22 = vpack.c.bf16 %v358_v42, %v349_v21  ;;  %v394_v34 = vmul.f32 %v2566_v49, %v149_v16  ;;  %v412_v21 = vmul.f32 %v2566_v49, %v167_v46 }
  0xb5   :  { %1494 = vmatmul.mubr.bf16.gmra.mrb[12].mxu0 %v506_v10  ;;  %1217 = vmatprep.mubr.bf16.mxu1 %v512_v35  ;;  %v521_v40 = vpack.c.bf16 %v377_v41, %v368_v28  ;;  %v431_v28 = vmul.f32 %v2560_v47, %v186_v15  ;;  %v137_v15 = vld [vmem:[%s4057_s2 + $0x358] sm:$0xff] }
  0xb6   :  { %1503 = vmatprep.mubr.bf16.mxu0 %v516_v25  ;;  %1813 = vmatpush1.bf16.msra.mxu1 %v2872_v58  ;;  %v135_v58 = vld [vmem:[%s4057_s2 + $0x348] sm:$0xff]  ;;  %v538_v41 = vpack.c.bf16 %v412_v21, %v403_v39  ;;  %v172_v21 = vld [vmem:[%s4057_s2 + $0x470] sm:$0xff] }
  0xb7   :  { %1798 = vmatprep.subr.bf16.mxu1 %v2887_v2  ;;  %v141_v2 = vld [vmem:[%s4057_s2 + $0x378] sm:$0xff]  ;;  %v163_v39 = vld [vmem:[%s4057_s2 + $0x428] sm:$0xff] }
  0xb8   :  { %v386_v52 = vmul.f32 %v2560_v47, %v141_v2 }
  0xba   :  { %1814 = vmatpush1.bf16.msra.mxu1 %v2924_v27  ;;  %v380_v27 = vmul.f32 %v3188_v6, %v135_v58  ;;  %v530_v7 = vpack.c.bf16 %v395_v38, %v386_v52  ;;  %v92_v52 = vld [vmem:[%s4057_s2 + $0x1f0] sm:$0xff]  ;;  %v222_v38 = vld [vmem:[%s4057_s2 + $0x600] sm:$0xff] }
  0xbb   :  { %1799 = vmatprep.subr.bf16.mxu1 %v2933_v33  ;;  %v4064_v33 = vsub.s32 0, %v2458_v8  ;;  %v47_v8 = vld [vmem:[%s4057_s2 + $0x88] sm:$0xff]  ;;  %v467_v16 = vmul.f32 %v2560_v47, %v222_v38  ;;  %v208_v38 = vld [vmem:[%s4057_s2 + $0x590] sm:$0xff] }
  0xbc   :  { %1218 = vmatmul.mubr.bf16.gmra.mrb[16].mxu1 %v511_v22  ;;  %v524_v31 = vpack.c.bf16 %v380_v27, %v371_v37  ;;  %v176_v22 = vld [vmem:[%s4057_s2 + $0x490] sm:$0xff]  ;;  %v557_v37 = vpack.c.bf16 %v449_v30, %v440_v11  ;;  %v203_v27 = vld [vmem:[%s4057_s2 + $0x568] sm:$0xff]  ;;  %v426_v11 = vmul.f32 %v2563_v48, %v181_v60  ;;  %v435_v30 = vmul.f32 %v2563_v48, %v190_v63 }
  0xbd   :  { %1504 = vmatmul.mubr.bf16.gmra.mrb[16].mxu0 %v515_v29  ;;  %1227 = vmatprep.mubr.bf16.mxu1 %v521_v40  ;;  %v3594_v14 = vrot.slane %v2010_v24, %v4064_v33  ;;  %v185_v29 = vld [vmem:[%s4057_s2 + $0x4d8] sm:$0xff]  ;;  %v74_v40 = vld [vmem:[%s4057_s2 + $0x160] sm:$0xff] }
  0xbe   :  { %1513 = vmatprep.mubr.bf16.mxu0 %v525_v23  ;;  %1815 = vmatpush1.bf16.msra.mxu1 %v2967_v0  ;;  %v38_v0 = vld [vmem:[%s4057_s2 + $0x40] sm:$0xff]  ;;  %v421_v23 = vmul.f32 %v2566_v49, %v176_v22  ;;  %v430_v58 = vmul.f32 %v2566_v49, %v185_v29  ;;  %v171_v29 = vld [vmem:[%s4057_s2 + $0x468] sm:$0xff] }
  0xbf   :  { %1800 = vmatprep.subr.bf16.mxu1 %v2982_v9  ;;  %v159_v9 = vld [vmem:[%s4057_s2 + $0x408] sm:$0xff]  ;;  %v283_v10 = vmul.f32 %v3594_v14, %v38_v0  ;;  %v292_v35 = vmul.f32 %v3594_v14, %v47_v8  ;;  %v301_v42 = vmul.f32 %v3594_v14, %v56_v32  ;;  %v319_v2 = vmul.f32 %v3594_v14, %v74_v40  ;;  %v194_v24 = vld [vmem:[%s4057_s2 + $0x520] sm:$0xff] }
  0xc0   :  { %v404_v62 = vmul.f32 %v2560_v47, %v159_v9  ;;  %v328_v4 = vmul.f32 %v3594_v14, %v83_v56  ;;  %v439_v33 = vmul.f32 %v2566_v49, %v194_v24  ;;  %v212_v9 = vld [vmem:[%s4057_s2 + $0x5b0] sm:$0xff]  ;;  %v162_v22 = vld [vmem:[%s4057_s2 + $0x420] sm:$0xff]  ;;  %v155_v56 = vld [vmem:[%s4057_s2 + $0x3e8] sm:$0xff] }
  0xc1   :  { %v146_v40 = vld [vmem:[%s4057_s2 + $0x3a0] sm:$0xff]  ;;  %v180_v24 = vld [vmem:[%s4057_s2 + $0x4b0] sm:$0xff] }
  0xc2   :  { %1816 = vmatpush1.bf16.msra.mxu1 %v3019_v43  ;;  %v529_v43 = vpack.c.bf16 %v394_v34, %v385_v54  ;;  %v539_v25 = vpack.c.bf16 %v413_v13, %v404_v62  ;;  %v110_v54 = vld [vmem:[%s4057_s2 + $0x280] sm:$0xff]  ;;  %v145_v34 = vld [vmem:[%s4057_s2 + $0x398] sm:$0xff]  ;;  %v466_v62 = vmul.f32 %v2566_v49, %v221_v53  ;;  %v207_v53 = vld [vmem:[%s4057_s2 + $0x588] sm:$0xff] }
  0xc3   :  { %1801 = vmatprep.subr.bf16.mxu1 %v3028_v51  ;;  %v481_v51 = vpack.c.bf16 %v292_v35, %v283_v10  ;;  %v154_v10 = vld [vmem:[%s4057_s2 + $0x3e0] sm:$0xff]  ;;  %v457_v35 = vmul.f32 %v2566_v49, %v212_v9  ;;  %v355_v13 = vmul.f32 %v3594_v14, %v110_v54 }
  0xc4   :  { %1228 = vmatmul.mubr.bf16.gmra.mrb[20].mxu1 %v520_v55  ;;  %v448_v55 = vmul.f32 %v2566_v49, %v203_v27  ;;  %v144_v49 = vld [vmem:[%s4057_s2 + $0x390] sm:$0xff]  ;;  %v189_v27 = vld [vmem:[%s4057_s2 + $0x4f8] sm:$0xff]  ;;  %v198_v9 = vld [vmem:[%s4057_s2 + $0x540] sm:$0xff] }
  0xc5   :  { %1514 = vmatmul.mubr.bf16.gmra.mrb[20].mxu0 %v524_v31  ;;  %1237 = vmatprep.mubr.bf16.mxu1 %v530_v7  ;;  %v337_v31 = vmul.f32 %v3594_v14, %v92_v52  ;;  %v565_v1 = vpack.c.bf16 %v466_v62, %v457_v35  ;;  %v164_v52 = vld [vmem:[%s4057_s2 + $0x430] sm:$0xff]  ;;  %v182_v54 = vld [vmem:[%s4057_s2 + $0x4c0] sm:$0xff]  ;;  %v443_v35 = vmul.f32 %v3188_v6, %v198_v9 }
  0xc6   :  { %1606 = vmatprep.mubr.bf16.mxu0 %v2035_v59  ;;  %1817 = vmatpush1.bf16.msra.mxu1 %v3071_v18  ;;  %v65_v18 = vld [vmem:[%s4057_s2 + $0x118] sm:$0xff]  ;;  %v556_v0 = vpack.c.bf16 %v448_v55, %v439_v33  ;;  %v425_v33 = vmul.f32 %v3188_v6, %v180_v24  ;;  %v434_v55 = vmul.f32 %v3188_v6, %v189_v27 }
  0xc7   :  { %1802 = vmatprep.subr.bf16.mxu1 %v3077_v20  ;;  %v177_v20 = vld [vmem:[%s4057_s2 + $0x498] sm:$0xff]  ;;  %v310_v45 = vmul.f32 %v3594_v14, %v65_v18  ;;  %v452_v62 = vmul.f32 %v3188_v6, %v207_v53 }
  0xc8   :  { %v422_v44 = vmul.f32 %v2560_v47, %v177_v20  ;;  %v153_v18 = vld [vmem:[%s4057_s2 + $0x3d8] sm:$0xff]  ;;  %v128_v20 = vld [vmem:[%s4057_s2 + $0x310] sm:$0xff] }
  0xc9   :  { %v490_v50 = vpack.c.bf16 %v310_v45, %v301_v42  ;;  %v389_v42 = vmul.f32 %v3188_v6, %v144_v49  ;;  %v398_v45 = vmul.f32 %v3188_v6, %v153_v18  ;;  %v216_v49 = vld [vmem:[%s4057_s2 + $0x5d0] sm:$0xff]  ;;  %v225_v18 = vld [vmem:[%s4057_s2 + $0x618] sm:$0xff] }
  0xca   :  { %1818 = vmatpush1.bf16.msra.mxu1 %v3116_v61  ;;  %v4065_v61 = vld [vmem:[#allocation5_spill] sm:$0xff]  ;;  %v548_v57 = vpack.c.bf16 %v431_v28, %v422_v44  ;;  %v373_v44 = vmul.f32 %v3594_v14, %v128_v20  ;;  %v382_v28 = vmul.f32 %v3594_v14, %v137_v15  ;;  %v200_v20 = vld [vmem:[%s4057_s2 + $0x550] sm:$0xff]  ;;  %v461_v15 = vmul.f32 %v3188_v6, %v216_v49 }
  0xcb   :  { %1803 = vmatprep.subr.bf16.mxu1 %v3125_v5  ;;  %v4066_v5 = vld [vmem:[#allocation6_spill] sm:$0xff] }
  0xcc   :  { %1238 = vmatmul.mubr.bf16.gmra.mrb[24].mxu1 %v529_v43 }
  0xcd   :  { %1780 = vmatmul.mubr.msk.bf16.vlgmr.msra.gmra.mrb[0].mxu0 %vm968_vm0, %v481_v51  ;;  %1247 = vmatprep.mubr.bf16.mxu1 %v539_v25  ;;  %v390_v51 = vmul.f32 %v2563_v48, %v145_v34  ;;  %v399_v25 = vmul.f32 %v2563_v48, %v154_v10  ;;  %v217_v34 = vld [vmem:[%s4057_s2 + $0x5d8] sm:$0xff]  ;;  %v226_v10 = vld [vmem:[%s4057_s2 + $0x620] sm:$0xff] }
  0xce   :  { %1616 = vmatprep.mubr.bf16.mxu0 %v2035_v59  ;;  %1819 = vmatpush1.bf16.msra.mxu1 %v4065_v61  ;;  %v408_v61 = vmul.f32 %v2563_v48, %v163_v39  ;;  %v470_v39 = vmul.f32 %v3188_v6, %v225_v18 }
  0xcf   :  { %1804 = vmatprep.subr.bf16.mxu1 %v4066_v5  ;;  %v534_v32 = vpack.c.bf16 %v399_v25, %v390_v51  ;;  %v417_v5 = vmul.f32 %v2563_v48, %v172_v21  ;;  %v462_v51 = vmul.f32 %v2563_v48, %v217_v34  ;;  %v471_v25 = vmul.f32 %v2563_v48, %v226_v10 }
  0xd0   :  { %v445_v21 = vmul.f32 %v3594_v14, %v200_v20 }
  0xd2   :  { %1820 = vmatpush1.bf16.msra.mxu1 %v3216_v26  ;;  %v547_v26 = vpack.c.bf16 %v430_v58, %v421_v23  ;;  %v407_v23 = vmul.f32 %v3188_v6, %v162_v22  ;;  %v416_v58 = vmul.f32 %v3188_v6, %v171_v29 }
  0xd3   :  { %1805 = vmatprep.subr.bf16.mxu1 %v3225_v36  ;;  %v499_v36 = vpack.c.bf16 %v328_v4, %v319_v2  ;;  %v391_v2 = vmul.f32 %v3594_v14, %v146_v40  ;;  %v400_v4 = vmul.f32 %v3594_v14, %v155_v56 }
  0xd4   :  { %1248 = vmatmul.mubr.bf16.gmra.mrb[28].mxu1 %v538_v41  ;;  %v533_v41 = vpack.c.bf16 %v398_v45, %v389_v42  ;;  %v569_v45 = vpack.c.bf16 %v470_v39, %v461_v15 }
  0xd5   :  { %1781 = vmatmul.mubr.msk.bf16.gmra.mrb[4].mxu0 %vm968_vm0, %v490_v50  ;;  %1257 = vmatprep.mubr.bf16.mxu1 %v548_v57  ;;  %v526_v50 = vpack.c.bf16 %v382_v28, %v373_v44  ;;  %v543_v57 = vpack.c.bf16 %v417_v5, %v408_v61  ;;  %v218_v28 = vld [vmem:[%s4057_s2 + $0x5e0] sm:$0xff]  ;;  %v227_v61 = vld [vmem:[%s4057_s2 + $0x628] sm:$0xff] }
  0xd6   :  { %1626 = vmatprep.mubr.bf16.mxu0 %v2035_v59  ;;  %1821 = vmatpush1.bf16.msra.mxu1 %v3268_v3  ;;  %v101_v3 = vld [vmem:[%s4057_s2 + $0x238] sm:$0xff]  ;;  %v463_v6 = vmul.f32 %v3594_v14, %v218_v28  ;;  %v472_v5 = vmul.f32 %v3594_v14, %v227_v61 }
  0xd7   :  { %1806 = vmatprep.subr.bf16.mxu1 %v3272_v19  ;;  %v213_v19 = vld [vmem:[%s4057_s2 + $0x5b8] sm:$0xff]  ;;  %v346_v7 = vmul.f32 %v3594_v14, %v101_v3 }
  0xd8   :  { %v458_v17 = vmul.f32 %v2560_v47, %v213_v19  ;;  %v119_v47 = vld [vmem:[%s4057_s2 + $0x2c8] sm:$0xff]  ;;  %v173_v3 = vld [vmem:[%s4057_s2 + $0x478] sm:$0xff] }
  0xd9   :  { %v364_v43 = vmul.f32 %v3594_v14, %v119_v47  ;;  %v199_v19 = vld [vmem:[%s4057_s2 + $0x548] sm:$0xff] }
  0xda   :  { %1822 = vmatpush1.bf16.msra.mxu1 %v3300_v12  ;;  %v508_v12 = vpack.c.bf16 %v346_v7, %v337_v31  ;;  %v566_v8 = vpack.c.bf16 %v467_v16, %v458_v17  ;;  %v409_v31 = vmul.f32 %v3594_v14, %v164_v52  ;;  %v418_v7 = vmul.f32 %v3594_v14, %v173_v3  ;;  %v191_v47 = vld [vmem:[%s4057_s2 + $0x508] sm:$0xff] }
  0xdb   :  { %v517_v46 = vpack.c.bf16 %v364_v43, %v355_v13  ;;  %v444_v17 = vmul.f32 %v2563_v48, %v199_v19  ;;  %v453_v16 = vmul.f32 %v2563_v48, %v208_v38  ;;  %v427_v13 = vmul.f32 %v3594_v14, %v182_v54  ;;  %v209_v48 = vld [vmem:[%s4057_s2 + $0x598] sm:$0xff]  ;;  %s2036_s2 = smov [#allocation2]  }
  0xdc   :  { %1258 = vmatmul.mubr.bf16.gmra.mrb[32].mxu1 %v547_v26  ;;  %v542_v26 = vpack.c.bf16 %v416_v58, %v407_v23  ;;  %v436_v43 = vmul.f32 %v3594_v14, %v191_v47  ;;  %v454_v42 = vmul.f32 %v3594_v14, %v209_v48  ;;  %s1767_s8 = sshll.u32 %s2036_s2, 4  ;;  %s1768_s8 = int_to_ptr.vmem [resolvable:$true] %s1767_s8 }
  0xdd   :  { %1782 = vmatmul.mubr.msk.bf16.gmra.mrb[8].mxu0 %vm968_vm0, %v499_v36  ;;  %1267 = vmatprep.mubr.bf16.mxu1 %v557_v37  ;;  %v535_v36 = vpack.c.bf16 %v400_v4, %v391_v2  ;;  %v552_v37 = vpack.c.bf16 %v435_v30, %v426_v11  ;;  %s2011_s9 = scalar_lea.vmem %s1768_s8, 5632  ;;  %p2016_p1 = scmp.lt.s32.totalorder %s1768_s8, %s1768_s8 }
  0xde   :  { %1636 = vmatprep.mubr.bf16.mxu0 %v2035_v59  ;;  %v562_v44 = vpack.c.bf16 %v454_v42, %v445_v21  ;;  %p2012_p0 = scmp.ne.s32.totalorder %s1768_s8, %s2011_s9  ;;  %p2017_p2 = scmp.lt.s32.totalorder %s2011_s9, %s2011_s9 }
  0xe0   :  { %p2018_p3 = por %p2017_p2, %p2016_p1 }
  0xe2   :  { %p2019_p4 = pnand %p2018_p3, %p2012_p0 }
  0xe4   :  { %1268 = vmatmul.mubr.bf16.gmra.mrb[36].mxu1 %v556_v0  ;;  %v551_v0 = vpack.c.bf16 %v434_v55, %v425_v33 }
  0xe5   :  { %1783 = vmatmul.mubr.msk.bf16.gmra.mrb[12].mxu0 %vm968_vm0, %v508_v12  ;;  %1277 = vmatprep.mubr.bf16.mxu1 %v566_v8  ;;  %v544_v12 = vpack.c.bf16 %v418_v7, %v409_v31  ;;  %v561_v8 = vpack.c.bf16 %v453_v16, %v444_v17 }
  0xe6   :  { %1646 = vmatprep.mubr.bf16.mxu0 %v2035_v59 }
  0xec   :  { %1278 = vmatmul.mubr.bf16.gmra.mrb[40].mxu1 %v565_v1  ;;  %v560_v1 = vpack.c.bf16 %v452_v62, %v443_v35 }
  0xed   :  { %1784 = vmatmul.mubr.msk.bf16.gmra.mrb[16].mxu0 %vm968_vm0, %v517_v46  ;;  %1523 = vmatprep.mubr.bf16.mxu1 %v534_v32  ;;  %v553_v46 = vpack.c.bf16 %v436_v43, %v427_v13  ;;  %v570_v32 = vpack.c.bf16 %v471_v25, %v462_v51 }
  0xee   :  { %1656 = vmatprep.mubr.bf16.mxu0 %v2035_v59 }
  0xf4   :  { %1524 = vmatmul.mubr.bf16.vlgmr.msra.gmra.mrb[44].mxu1 %v533_v41  ;;  %v571_v41 = vpack.c.bf16 %v472_v5, %v463_v6 }
  0xf5   :  { %1785 = vmatmul.mubr.msk.bf16.gmra.mrb[20].mxu0 %vm968_vm0, %v526_v50  ;;  %1533 = vmatprep.mubr.bf16.mxu1 %v543_v57 }
  0xf6   :  { %1666 = vmatprep.mubr.bf16.mxu0 %v2035_v59 }
  0xfc   :  { %1534 = vmatmul.mubr.bf16.gmra.mrb[48].mxu1 %v542_v26 }
  0xfd   :  { %1786 = vmatmul.mubr.msk.bf16.gmra.mrb[44].mxu0 %vm968_vm0, %v535_v36  ;;  %1543 = vmatprep.mubr.bf16.mxu1 %v552_v37 }
  0xfe   :  { %1676 = vmatprep.mubr.bf16.mxu0 %v2035_v59 }
 0x104   :  { %1544 = vmatmul.mubr.bf16.gmra.mrb[52].mxu1 %v551_v0 }
 0x105   :  { %1787 = vmatmul.mubr.msk.bf16.gmra.mrb[48].mxu0 %vm968_vm0, %v544_v12  ;;  %1553 = vmatprep.mubr.bf16.mxu1 %v561_v8 }
 0x106   :  { %1686 = vmatprep.mubr.bf16.mxu0 %v2035_v59 }
 0x10c   :  { %1554 = vmatmul.mubr.bf16.gmra.mrb[56].mxu1 %v560_v1 }
 0x10d   :  { %1788 = vmatmul.mubr.msk.bf16.gmra.mrb[52].mxu0 %vm968_vm0, %v553_v46  ;;  %1563 = vmatprep.mubr.bf16.mxu1 %v570_v32 }
 0x10e   :  { %1696 = vmatprep.mubr.bf16.mxu0 %v2035_v59 }
 0x114   :  { %1564 = vmatmul.mubr.bf16.gmra.mrb[60].mxu1 %v569_v45 }
 0x115   :  { %1789 = vmatmul.mubr.msk.bf16.gmra.mrb[56].mxu0 %vm968_vm0, %v562_v44 }
 0x116   :  { %1706 = vmatprep.mubr.bf16.mxu0 %v2035_v59 }
 0x11d   :  { %1790 = vmatmul.mubr.msk.bf16.gmra.mrb[60].mxu0 %vm968_vm0, %v571_v41 }
 0x148   :  { %v1382_v50 = vpop.f32.mrb[24].mxu0 }
 0x149   :  { %v1384_v57 = vpop.f32.mrb[25].mxu0 }
 0x14a   :  { %v1386_v22 = vpop.f32.mrb[26].mxu0 }
 0x14b   :  { %v1388_v29 = vpop.f32.mrb[27].mxu0 }
 0x150   :  { %v1392_v40 = vpop.f32.mrb[28].mxu0 }
 0x151   :  { %v3871_v56 = vpop.f32.mrb[29].mxu0 }
 0x152   :  { %v3873_v60 = vpop.f32.mrb[30].mxu0 }
 0x153   :  { %v3875_v63 = vpop.f32.mrb[31].mxu0 }
 0x158   :  { %v3877_v23 = vpop.f32.mrb[32].mxu0 }
 0x159   :  { %v3879_v58 = vpop.f32.mrb[33].mxu0 }
 0x15a   :  { %v3881_v14 = vpop.f32.mrb[34].mxu0 }
 0x15b   :  { %v3883_v59 = vpop.f32.mrb[35].mxu0 }
 0x160   :  { %v3885_v2 = vpop.f32.mrb[36].mxu0 }
 0x161   :  { %v3887_v4 = vpop.f32.mrb[37].mxu0 }
 0x162   :  { %v3889_v11 = vpop.f32.mrb[38].mxu0 }
 0x163   :  { %v3891_v30 = vpop.f32.mrb[39].mxu0 }
 0x168   :  { %v3893_v26 = vpop.f32.mrb[40].mxu0 }
 0x169   :  { %v3895_v36 = vpop.f32.mrb[41].mxu0 }
 0x16a   :  { %v3897_v37 = vpop.f32.mrb[42].mxu0 }
 0x16b   :  { %v3899_v24 = vpop.f32.mrb[43].mxu0 }
 0x16f   :  { %v1179_v27 = vpop.f32.mrb[0].mxu1 }
 0x170   :  { %v1181_v52 = vpop.f32.mrb[1].mxu1 }
 0x171   :  { %v1183_v3 = vpop.f32.mrb[2].mxu1 }
 0x172   :  { %v1185_v19 = vpop.f32.mrb[3].mxu1 }
 0x177   :  { %v1189_v38 = vpop.f32.mrb[4].mxu1 }
 0x178   :  { %v1191_v33 = vpop.f32.mrb[5].mxu1 }
 0x179   :  { %v1193_v55 = vpop.f32.mrb[6].mxu1 }
 0x17a   :  { %v1195_v31 = vpop.f32.mrb[7].mxu1 }
 0x17f   :  { %v1199_v7 = vpop.f32.mrb[8].mxu1 }
 0x180   :  { %v3901_v17 = vpop.f32.mrb[9].mxu1 }
 0x181   :  { %v3903_v16 = vpop.f32.mrb[10].mxu1 }
 0x182   :  { %v3905_v0 = vpop.f32.mrb[11].mxu1 }
 0x187   :  { %v3907_v12 = vpop.f32.mrb[12].mxu1 }
 0x188   :  { %v3909_v8 = vpop.f32.mrb[13].mxu1 }
 0x189   :  { %v3911_v9 = vpop.f32.mrb[14].mxu1 }
 0x18a   :  { %v3913_v53 = vpop.f32.mrb[15].mxu1 }
 0x18f   :  { %v3915_v54 = vpop.f32.mrb[16].mxu1 }
 0x190   :  { %v3917_v47 = vpop.f32.mrb[17].mxu1 }
 0x191   :  { %v3919_v34 = vpop.f32.mrb[18].mxu1 }
 0x192   :  { %v3921_v10 = vpop.f32.mrb[19].mxu1 }
 0x197   :  { %v3923_v35 = vpop.f32.mrb[20].mxu1 }
 0x198   :  { %v3925_v62 = vpop.f32.mrb[21].mxu1 }
 0x199   :  { %v3927_v13 = vpop.f32.mrb[22].mxu1 }
 0x19a   :  { %v3929_v43 = vpop.f32.mrb[23].mxu1 }
 0x19f   :  { %v1239_v51 = vpop.f32.mrb[24].mxu1 }
 0x1a0   :  { %v3931_v25 = vadd.f32 %v1382_v50, %v1239_v51  ;;  %v1608_v1 = vpop.f32.mrb[0].mxu0  ;;  %v1241_v46 = vpop.f32.mrb[25].mxu1 }
 0x1a1   :  { %v1823_v32 = vadd.f32 %v1608_v1, %v1179_v27  ;;  %v3933_v49 = vadd.f32 %v1384_v57, %v1241_v46  ;;  %v1610_v18 = vpop.f32.mrb[1].mxu0  ;;  %v1243_v20 = vpop.f32.mrb[26].mxu1 }
 0x1a2   :  { %v1824_v48 = vadd.f32 %v1610_v18, %v1181_v52  ;;  %v3935_v15 = vadd.f32 %v1386_v22, %v1243_v20  ;;  %v1612_v39 = vpop.f32.mrb[2].mxu0  ;;  %v1245_v21 = vpop.f32.mrb[27].mxu1 }
 0x1a3   :  { %1717 = vst [vmem:[#allocation2] sm:$0xff] %v1823_v32  ;;  %v1825_v42 = vadd.f32 %v1612_v39, %v1183_v3  ;;  %v3937_v45 = vadd.f32 %v1388_v29, %v1245_v21  ;;  %v1614_v44 = vpop.f32.mrb[3].mxu0 }
 0x1a4   :  { %1719 = vst.msk [vmem:[#allocation2 + $0x8] sm:$0xff] %vm1718_vm1, %v1824_v48  ;;  %v1826_v28 = vadd.f32 %v1614_v44, %v1185_v19 }
 0x1a5   :  { %1720 = vst [vmem:[#allocation2 + $0x10] sm:$0xff] %v1825_v42 }
 0x1a6   :  { %1721 = vst.msk [vmem:[#allocation2 + $0x18] sm:$0xff] %vm1718_vm1, %v1826_v28 }
 0x1a7   :  { %v1249_v61 = vpop.f32.mrb[28].mxu1 }
 0x1a8   :  { %v3941_v6 = vadd.f32 %v1392_v40, %v1249_v61  ;;  %v1618_v5 = vpop.f32.mrb[4].mxu0  ;;  %v1251_v41 = vpop.f32.mrb[29].mxu1 }
 0x1a9   :  { %v1827_v50 = vadd.f32 %v1618_v5, %v1189_v38  ;;  %v3944_v57 = vadd.f32 %v3871_v56, %v1251_v41  ;;  %v1620_v22 = vpop.f32.mrb[5].mxu0  ;;  %v1253_v27 = vpop.f32.mrb[30].mxu1 }
 0x1aa   :  { %v1828_v29 = vadd.f32 %v1620_v22, %v1191_v33  ;;  %v3947_v52 = vadd.f32 %v3873_v60, %v1253_v27  ;;  %v1622_v3 = vpop.f32.mrb[6].mxu0  ;;  %v1255_v19 = vpop.f32.mrb[31].mxu1 }
 0x1ab   :  { %1722 = vst [vmem:[#allocation2 + $0x20] sm:$0xff] %v1827_v50  ;;  %v1829_v51 = vadd.f32 %v1622_v3, %v1193_v55  ;;  %v3950_v1 = vadd.f32 %v3875_v63, %v1255_v19  ;;  %v1624_v40 = vpop.f32.mrb[7].mxu0 }
 0x1ac   :  { %1723 = vst.msk [vmem:[#allocation2 + $0x28] sm:$0xff] %vm1718_vm1, %v1828_v29  ;;  %v1830_v38 = vadd.f32 %v1624_v40, %v1195_v31 }
 0x1ad   :  { %1724 = vst [vmem:[#allocation2 + $0x30] sm:$0xff] %v1829_v51 }
 0x1ae   :  { %1725 = vst.msk [vmem:[#allocation2 + $0x38] sm:$0xff] %vm1718_vm1, %v1830_v38 }
 0x1af   :  { %v1259_v56 = vpop.f32.mrb[32].mxu1 }
 0x1b0   :  { %v3955_v33 = vadd.f32 %v3877_v23, %v1259_v56  ;;  %v1628_v60 = vpop.f32.mrb[8].mxu0  ;;  %v1261_v46 = vpop.f32.mrb[33].mxu1 }
 0x1b1   :  { %v1831_v32 = vadd.f32 %v1628_v60, %v1199_v7  ;;  %v3958_v18 = vadd.f32 %v3879_v58, %v1261_v46  ;;  %v1630_v55 = vpop.f32.mrb[9].mxu0  ;;  %v1263_v63 = vpop.f32.mrb[34].mxu1 }
 0x1b2   :  { %v1832_v20 = vadd.f32 %v1630_v55, %v3901_v17  ;;  %v3962_v48 = vadd.f32 %v3881_v14, %v1263_v63  ;;  %v1632_v31 = vpop.f32.mrb[10].mxu0  ;;  %v1265_v39 = vpop.f32.mrb[35].mxu1 }
 0x1b3   :  { %1726 = vst [vmem:[#allocation2 + $0x40] sm:$0xff] %v1831_v32  ;;  %v1833_v21 = vadd.f32 %v1632_v31, %v3903_v16  ;;  %v3966_v23 = vadd.f32 %v3883_v59, %v1265_v39  ;;  %v1634_v42 = vpop.f32.mrb[11].mxu0 }
 0x1b4   :  { %1727 = vst.msk [vmem:[#allocation2 + $0x48] sm:$0xff] %vm1718_vm1, %v1832_v20  ;;  %v1834_v58 = vadd.f32 %v1634_v42, %v3905_v0 }
 0x1b5   :  { %1728 = vst [vmem:[#allocation2 + $0x50] sm:$0xff] %v1833_v21 }
 0x1b6   :  { %1729 = vst.msk [vmem:[#allocation2 + $0x58] sm:$0xff] %vm1718_vm1, %v1834_v58 }
 0x1b7   :  { %v1269_v7 = vpop.f32.mrb[36].mxu1 }
 0x1b8   :  { %v3972_v14 = vadd.f32 %v3885_v2, %v1269_v7  ;;  %v1638_v17 = vpop.f32.mrb[12].mxu0  ;;  %v1271_v44 = vpop.f32.mrb[37].mxu1 }
 0x1b9   :  { %v1835_v28 = vadd.f32 %v1638_v17, %v3907_v12  ;;  %v3976_v16 = vadd.f32 %v3887_v4, %v1271_v44  ;;  %v1640_v59 = vpop.f32.mrb[13].mxu0  ;;  %v1273_v61 = vpop.f32.mrb[38].mxu1 }
 0x1ba   :  { %v1836_v5 = vadd.f32 %v1640_v59, %v3909_v8  ;;  %v3980_v0 = vadd.f32 %v3889_v11, %v1273_v61  ;;  %v1642_v41 = vpop.f32.mrb[14].mxu0  ;;  %v1275_v50 = vpop.f32.mrb[39].mxu1 }
 0x1bb   :  { %1730 = vst [vmem:[#allocation2 + $0x60] sm:$0xff] %v1835_v28  ;;  %v1837_v2 = vadd.f32 %v1642_v41, %v3911_v9  ;;  %v3984_v22 = vadd.f32 %v3891_v30, %v1275_v50  ;;  %v1644_v27 = vpop.f32.mrb[15].mxu0 }
 0x1bc   :  { %1731 = vst.msk [vmem:[#allocation2 + $0x68] sm:$0xff] %vm1718_vm1, %v1836_v5  ;;  %v1838_v4 = vadd.f32 %v1644_v27, %v3913_v53 }
 0x1bd   :  { %1732 = vst [vmem:[#allocation2 + $0x70] sm:$0xff] %v1837_v2 }
 0x1be   :  { %1733 = vst.msk [vmem:[#allocation2 + $0x78] sm:$0xff] %vm1718_vm1, %v1838_v4 }
 0x1bf   :  { %v1279_v12 = vpop.f32.mrb[40].mxu1 }
 0x1c0   :  { %v3990_v11 = vadd.f32 %v3893_v26, %v1279_v12  ;;  %v1648_v8 = vpop.f32.mrb[16].mxu0  ;;  %v1281_v29 = vpop.f32.mrb[41].mxu1 }
 0x1c1   :  { %v1839_v3 = vadd.f32 %v1648_v8, %v3915_v54  ;;  %v3994_v9 = vadd.f32 %v3895_v36, %v1281_v29  ;;  %v1650_v30 = vpop.f32.mrb[17].mxu0  ;;  %v1283_v19 = vpop.f32.mrb[42].mxu1 }
 0x1c2   :  { %v1840_v51 = vadd.f32 %v1650_v30, %v3917_v47  ;;  %v3998_v53 = vadd.f32 %v3897_v37, %v1283_v19  ;;  %v1652_v40 = vpop.f32.mrb[18].mxu0  ;;  %v1285_v38 = vpop.f32.mrb[43].mxu1 }
 0x1c3   :  { %1734 = vst [vmem:[#allocation2 + $0x80] sm:$0xff] %v1839_v3  ;;  %v1841_v26 = vadd.f32 %v1652_v40, %v3919_v34  ;;  %v4002_v56 = vadd.f32 %v3899_v24, %v1285_v38  ;;  %v1654_v60 = vpop.f32.mrb[19].mxu0 }
 0x1c4   :  { %1735 = vst.msk [vmem:[#allocation2 + $0x88] sm:$0xff] %vm1718_vm1, %v1840_v51  ;;  %v1842_v36 = vadd.f32 %v1654_v60, %v3921_v10 }
 0x1c5   :  { %1736 = vst [vmem:[#allocation2 + $0x90] sm:$0xff] %v1841_v26 }
 0x1c6   :  { %1737 = vst.msk [vmem:[#allocation2 + $0x98] sm:$0xff] %vm1718_vm1, %v1842_v36 }
 0x1c7   :  { %v1525_v54 = vpop.f32.mrb[44].mxu1 }
 0x1c8   :  { %v1848_v37 = vadd.f32 %v3931_v25, %v1525_v54  ;;  %v1658_v47 = vpop.f32.mrb[20].mxu0  ;;  %v1527_v46 = vpop.f32.mrb[45].mxu1 }
 0x1c9   :  { %v1843_v32 = vadd.f32 %v1658_v47, %v3923_v35  ;;  %v1851_v34 = vadd.f32 %v3933_v49, %v1527_v46  ;;  %v1660_v55 = vpop.f32.mrb[21].mxu0  ;;  %v1529_v24 = vpop.f32.mrb[46].mxu1 }
 0x1ca   :  { %v1844_v63 = vadd.f32 %v1660_v55, %v3925_v62  ;;  %v1854_v20 = vadd.f32 %v3935_v15, %v1529_v24  ;;  %v1662_v31 = vpop.f32.mrb[22].mxu0  ;;  %v1531_v10 = vpop.f32.mrb[47].mxu1 }
 0x1cb   :  { %1738 = vst [vmem:[#allocation2 + $0xa0] sm:$0xff] %v1843_v32  ;;  %v1845_v39 = vadd.f32 %v1662_v31, %v3927_v13  ;;  %v1857_v21 = vadd.f32 %v3937_v45, %v1531_v10  ;;  %v1664_v25 = vpop.f32.mrb[23].mxu0 }
 0x1cc   :  { %1739 = vst.msk [vmem:[#allocation2 + $0xa8] sm:$0xff] %vm1718_vm1, %v1844_v63  ;;  %v1846_v35 = vadd.f32 %v1664_v25, %v3929_v43 }
 0x1cd   :  { %1740 = vst [vmem:[#allocation2 + $0xb0] sm:$0xff] %v1845_v39 }
 0x1ce   :  { %1741 = vst.msk [vmem:[#allocation2 + $0xb8] sm:$0xff] %vm1718_vm1, %v1846_v35 }
 0x1cf   :  { %v1535_v49 = vpop.f32.mrb[48].mxu1 }
 0x1d0   :  { %v1860_v62 = vadd.f32 %v3941_v6, %v1535_v49  ;;  %v1668_v42 = vpop.f32.mrb[44].mxu0  ;;  %v1537_v15 = vpop.f32.mrb[49].mxu1 }
 0x1d1   :  { %v1849_v58 = vadd.f32 %v1848_v37, %v1668_v42  ;;  %v1863_v7 = vadd.f32 %v3944_v57, %v1537_v15  ;;  %v1670_v17 = vpop.f32.mrb[45].mxu0  ;;  %v1539_v13 = vpop.f32.mrb[50].mxu1 }
 0x1d2   :  { %v1852_v44 = vadd.f32 %v1851_v34, %v1670_v17  ;;  %v1866_v45 = vadd.f32 %v3947_v52, %v1539_v13  ;;  %v1672_v28 = vpop.f32.mrb[46].mxu0  ;;  %v1541_v59 = vpop.f32.mrb[51].mxu1 }
 0x1d3   :  { %1742 = vst [vmem:[#allocation2 + $0xc0] sm:$0xff] %v1849_v58  ;;  %v1855_v43 = vadd.f32 %v1854_v20, %v1672_v28  ;;  %v1869_v61 = vadd.f32 %v3950_v1, %v1541_v59  ;;  %v1674_v5 = vpop.f32.mrb[47].mxu0 }
 0x1d4   :  { %1743 = vst.msk [vmem:[#allocation2 + $0xc8] sm:$0xff] %vm1718_vm1, %v1852_v44  ;;  %v1858_v6 = vadd.f32 %v1857_v21, %v1674_v5 }
 0x1d5   :  { %1744 = vst [vmem:[#allocation2 + $0xd0] sm:$0xff] %v1855_v43 }
 0x1d6   :  { %1745 = vst.msk [vmem:[#allocation2 + $0xd8] sm:$0xff] %vm1718_vm1, %v1858_v6 }
 0x1d7   :  { %v1545_v41 = vpop.f32.mrb[52].mxu1 }
 0x1d8   :  { %v1872_v57 = vadd.f32 %v3955_v33, %v1545_v41  ;;  %v1678_v50 = vpop.f32.mrb[48].mxu0  ;;  %v1547_v2 = vpop.f32.mrb[53].mxu1 }
 0x1d9   :  { %v1861_v27 = vadd.f32 %v1860_v62, %v1678_v50  ;;  %v1875_v52 = vadd.f32 %v3958_v18, %v1547_v2  ;;  %v1680_v4 = vpop.f32.mrb[49].mxu0  ;;  %v1549_v12 = vpop.f32.mrb[54].mxu1 }
 0x1da   :  { %v1864_v8 = vadd.f32 %v1863_v7, %v1680_v4  ;;  %v1878_v1 = vadd.f32 %v3962_v48, %v1549_v12  ;;  %v1682_v29 = vpop.f32.mrb[50].mxu0  ;;  %v1551_v3 = vpop.f32.mrb[55].mxu1 }
 0x1db   :  { %1746 = vst [vmem:[#allocation2 + $0xe0] sm:$0xff] %v1861_v27  ;;  %v1867_v30 = vadd.f32 %v1866_v45, %v1682_v29  ;;  %v1881_v19 = vadd.f32 %v3966_v23, %v1551_v3  ;;  %v1684_v51 = vpop.f32.mrb[51].mxu0 }
 0x1dc   :  { %1747 = vst.msk [vmem:[#allocation2 + $0xe8] sm:$0xff] %vm1718_vm1, %v1864_v8  ;;  %v1870_v33 = vadd.f32 %v1869_v61, %v1684_v51 }
 0x1dd   :  { %1748 = vst [vmem:[#allocation2 + $0xf0] sm:$0xff] %v1867_v30 }
 0x1de   :  { %1749 = vst.msk [vmem:[#allocation2 + $0xf8] sm:$0xff] %vm1718_vm1, %v1870_v33 }
 0x1df   :  { %v1555_v40 = vpop.f32.mrb[56].mxu1 }
 0x1e0   :  { %v1884_v18 = vadd.f32 %v3972_v14, %v1555_v40  ;;  %v1688_v38 = vpop.f32.mrb[52].mxu0  ;;  %v1557_v26 = vpop.f32.mrb[57].mxu1 }
 0x1e1   :  { %v1873_v60 = vadd.f32 %v1872_v57, %v1688_v38  ;;  %v1887_v48 = vadd.f32 %v3976_v16, %v1557_v26  ;;  %v1690_v36 = vpop.f32.mrb[53].mxu0  ;;  %v1559_v54 = vpop.f32.mrb[58].mxu1 }
 0x1e2   :  { %v1876_v37 = vadd.f32 %v1875_v52, %v1690_v36  ;;  %v1890_v23 = vadd.f32 %v3980_v0, %v1559_v54  ;;  %v1692_v47 = vpop.f32.mrb[54].mxu0  ;;  %v1561_v46 = vpop.f32.mrb[59].mxu1 }
 0x1e3   :  { %1750 = vst [vmem:[#allocation2 + $0x100] sm:$0xff] %v1873_v60  ;;  %v1879_v32 = vadd.f32 %v1878_v1, %v1692_v47  ;;  %v1893_v34 = vadd.f32 %v3984_v22, %v1561_v46  ;;  %v1694_v55 = vpop.f32.mrb[55].mxu0 }
 0x1e4   :  { %1751 = vst.msk [vmem:[#allocation2 + $0x108] sm:$0xff] %vm1718_vm1, %v1876_v37  ;;  %v1882_v14 = vadd.f32 %v1881_v19, %v1694_v55 }
 0x1e5   :  { %1752 = vst [vmem:[#allocation2 + $0x110] sm:$0xff] %v1879_v32 }
 0x1e6   :  { %1753 = vst.msk [vmem:[#allocation2 + $0x118] sm:$0xff] %vm1718_vm1, %v1882_v14 }
 0x1e7   :  { %v1565_v24 = vpop.f32.mrb[60].mxu1 }
 0x1e8   :  { %v1896_v16 = vadd.f32 %v3990_v11, %v1565_v24  ;;  %v1698_v63 = vpop.f32.mrb[56].mxu0  ;;  %v1567_v20 = vpop.f32.mrb[61].mxu1 }
 0x1e9   :  { %v1885_v31 = vadd.f32 %v1884_v18, %v1698_v63  ;;  %v1899_v0 = vadd.f32 %v3994_v9, %v1567_v20  ;;  %v1700_v10 = vpop.f32.mrb[57].mxu0  ;;  %v1569_v39 = vpop.f32.mrb[62].mxu1 }
 0x1ea   :  { %v1888_v21 = vadd.f32 %v1887_v48, %v1700_v10  ;;  %v1902_v22 = vadd.f32 %v3998_v53, %v1569_v39  ;;  %v1702_v25 = vpop.f32.mrb[58].mxu0  ;;  %v1571_v35 = vpop.f32.mrb[63].mxu1 }
 0x1eb   :  { %1754 = vst [vmem:[#allocation2 + $0x120] sm:$0xff] %v1885_v31  ;;  %v1891_v49 = vadd.f32 %v1890_v23, %v1702_v25  ;;  %v1905_v62 = vadd.f32 %v4002_v56, %v1571_v35  ;;  %v1704_v42 = vpop.f32.mrb[59].mxu0 }
 0x1ec   :  { %1755 = vst.msk [vmem:[#allocation2 + $0x128] sm:$0xff] %vm1718_vm1, %v1888_v21  ;;  %v1894_v11 = vadd.f32 %v1893_v34, %v1704_v42 }
 0x1ed   :  { %1756 = vst [vmem:[#allocation2 + $0x130] sm:$0xff] %v1891_v49 }
 0x1ee   :  { %1757 = vst.msk [vmem:[#allocation2 + $0x138] sm:$0xff] %vm1718_vm1, %v1894_v11 }
 0x1f0   :  { %v1708_v15 = vpop.f32.mrb[60].mxu0 }
 0x1f1   :  { %v1897_v9 = vadd.f32 %v1896_v16, %v1708_v15  ;;  %v1710_v58 = vpop.f32.mrb[61].mxu0 }
 0x1f2   :  { %v1900_v7 = vadd.f32 %v1899_v0, %v1710_v58  ;;  %v1712_v53 = vpop.f32.mrb[62].mxu0 }
 0x1f3   :  { %1758 = vst [vmem:[#allocation2 + $0x140] sm:$0xff] %v1897_v9  ;;  %v1903_v17 = vadd.f32 %v1902_v22, %v1712_v53  ;;  %v1714_v13 = vpop.f32.mrb[63].mxu0 }
 0x1f4   :  { %1759 = vst.msk [vmem:[#allocation2 + $0x148] sm:$0xff] %vm1718_vm1, %v1900_v7  ;;  %v1906_v56 = vadd.f32 %v1905_v62, %v1714_v13 }
 0x1f5   :  { %1760 = vst [vmem:[#allocation2 + $0x150] sm:$0xff] %v1903_v17 }
 0x1f6   :  { %1761 = vst.msk [vmem:[#allocation2 + $0x158] sm:$0xff] %vm1718_vm1, %v1906_v56 }
 0x1f7   :  { %2022 = shalt.err (!%p2019_p4)
}
 0x1f8   :  { %s2023_s12 = scalar_lea.hbm %s4058_s3, 5632 }
 0x1f9   :  { %p2024_p5 = scmp.ne.s32.totalorder %s4058_s3, %s2023_s12  ;;  %p2027_p6 = scmp.lt.u32.totalorder %s2023_s12, %s4058_s3 }
 0x1fb   :  { %p2029_p7 = pnand %p2027_p6, %p2024_p5 }
 0x1fd   :  { %2032 = shalt.err (!%p2029_p7)
}
 0x1fe   :  { %s2037_s17 = smov 256   ;;  %s2038_s18 = smov 16  }
 0x1ff   :  { %1773 = dma.vmem_to_hbm [thread:$0]  %s1768_s8, 5632, %s4058_s3, [#allocation3], %s2037_s17, %s2037_s17, %s2038_s18  }
 0x200   :  { %2033 = dma.done.wait [#allocation3], 5632  }
 0x201   :  { %2034 = vsyncadd [#allocation3], 4294961664 }
 0x202   :  { %1777 = vsyncpa [#allocation3], 1 }

</bundles_post_ra>
